<compile_context>
chip_gen: v7x
topology: tpu7x:2x2x1
jax: 0.10.0
libtpu: 0.0.40
codegen_flags: <defaults>
</compile_context>

<pallas_src>
import numpy as np
import jax
import jax.numpy as jnp
from jax.experimental import pallas as pl
from jax.experimental.pallas import tpu as pltpu

_EPS = 1e-5
_NEG_SLOPE = 0.2


# ----------------------------- host-side matrices -----------------------------

def _bilinear_upsample_matrix(n: int) -> np.ndarray:
    """U of shape (n, 2n) s.t. x @ U == bilinear x2 upsample (align_corners=False)."""
    m = np.zeros((n, 2 * n), dtype=np.float32)
    for j in range(n):
        jm = max(j - 1, 0)
        jp = min(j + 1, n - 1)
        # even output 2j:  src = j - 0.25 -> 0.25*x[j-1] + 0.75*x[j] (edge clamped)
        m[jm, 2 * j] += 0.25
        m[j, 2 * j] += 0.75
        # odd output 2j+1: src = j + 0.25 -> 0.75*x[j] + 0.25*x[j+1] (edge clamped)
        m[j, 2 * j + 1] += 0.75
        m[jp, 2 * j + 1] += 0.25
    return m


def _shifted_uh_matrices(h: int) -> np.ndarray:
    """(3, 2h, h): transposed H-upsample matrix pre-composed with the -1/0/+1
    vertical shifts (zero fill):  uhs[a] = S_a @ UhT,  (S_a Z)[i] = Z[i+a-1]."""
    uhT = _bilinear_upsample_matrix(h).T                 # (2h, h)
    out = np.zeros((3, 2 * h, h), dtype=np.float32)
    out[0, 1:, :] = uhT[:-1, :]
    out[1] = uhT
    out[2, :-1, :] = uhT[1:, :]
    return out


def _uw_shift_matrices(w: int) -> np.ndarray:
    """(3, w, 2w): W-upsample matrix composed with the -1/0/+1 column shifts."""
    uw = _bilinear_upsample_matrix(w)                    # (w, 2w)
    out = np.zeros((3, w, 2 * w), dtype=np.float32)
    out[0, :, 1:] = uw[:, :-1]
    out[1] = uw
    out[2, :, :-1] = uw[:, 1:]
    return out


# --------------------------------- kernel -------------------------------------

def _instance_norm_lrelu_rows(x):
    """Single-pass InstanceNorm (affine=False, biased var, eps=1e-5) + LeakyReLU(0.2).

    x: (C, S) float32; statistics per row (= per channel over the spatial plane)."""
    inv_n = 1.0 / x.shape[-1]
    s = jnp.sum(x, axis=-1, keepdims=True)
    ss = jnp.sum(x * x, axis=-1, keepdims=True)
    mean = s * inv_n
    var = jnp.maximum(ss * inv_n - mean * mean, 0.0)
    y = (x - mean) * jax.lax.rsqrt(var + _EPS)
    return jnp.where(y >= 0, y, _NEG_SLOPE * y)


def _fused_kernel(x_ref, uhs_ref, mw_ref, wpw_ref, o_ref, acc_ref, flat_ref):
    """One batch item: upsample + 3x3 depthwise conv + IN + LReLU + 1x1 conv + IN + LReLU."""
    C, H, W = x_ref.shape
    H2 = uhs_ref.shape[1]
    W2 = mw_ref.shape[-1]

    x = x_ref[...]                                            # (C, H, W) f32

    # ---- bilinear x2 upsample fused with the depthwise 3x3 conv:
    #      out_c = sum_a uhs[a] @ x_c @ mw[a, c]   (6 channel-batched MXU matmuls)
    acc = jnp.zeros((C, H2, W2), jnp.float32)
    for a in range(3):
        # (C, H, W) x (C, W, W2) -> (C, H, W2)   [W-upsample + horizontal taps]
        t = jax.lax.dot_general(
            x, mw_ref[a],
            dimension_numbers=(((2,), (1,)), ((0,), (0,))),
            preferred_element_type=jnp.float32)
        # (C, H2, H) x (C, H, W2) -> (C, H2, W2) [H-upsample + vertical shift]
        uhs_b = jnp.broadcast_to(uhs_ref[a][None], (C, H2, H))
        acc = acc + jax.lax.dot_general(
            uhs_b, t,
            dimension_numbers=(((2,), (1,)), ((0,), (0,))),
            preferred_element_type=jnp.float32)
    acc_ref[...] = acc

    # ---- explicit relayout (C, H2, W2) -> (C, H2*W2) via per-row copies so the
    #      channel mixing below is one lane-dense 2D MXU matmul.
    for i in range(H2):
        flat_ref[:, i * W2:(i + 1) * W2] = acc_ref[:, i, :]

    y1 = _instance_norm_lrelu_rows(flat_ref[...])             # (C, S)

    # ---- 1x1 pointwise conv over channels: single (C, C) @ (C, S) MXU matmul.
    z = jnp.dot(wpw_ref[...], y1, preferred_element_type=jnp.float32)
    o_ref[...] = _instance_norm_lrelu_rows(z)


@jax.jit
def upsample_conv(x, w_dw, w_pw):
    """x: (N, C, H, W) f32; w_dw: (C, 3, 3) depthwise weights; w_pw: (C_out, C_in)."""
    N, C, H, W = x.shape
    H2, W2 = 2 * H, 2 * W
    S = H2 * W2

    uhs = jnp.asarray(_shifted_uh_matrices(H))                # (3, H2, H)  const
    uw_shifts = jnp.asarray(_uw_shift_matrices(W))            # (3, W, W2)  const
    # Fold the per-channel horizontal taps into the W-upsample matrices:
    #   mw[a, c] = sum_b w_dw[c, a, b] * uw_shifts[b]     ->  (3, C, W, W2)
    mw = jnp.einsum('cab,bwv->acwv', w_dw, uw_shifts,
                    precision=jax.lax.Precision.HIGHEST)

    out_flat = pl.pallas_call(
        _fused_kernel,
        out_shape=jax.ShapeDtypeStruct((N, C, S), jnp.float32),
        grid=(N,),
        in_specs=[
            pl.BlockSpec((None, C, H, W), lambda n: (n, 0, 0, 0)),
            pl.BlockSpec((3, H2, H), lambda n: (0, 0, 0)),
            pl.BlockSpec((3, C, W, W2), lambda n: (0, 0, 0, 0)),
            pl.BlockSpec((C, C), lambda n: (0, 0)),
        ],
        out_specs=pl.BlockSpec((None, C, S), lambda n: (n, 0, 0)),
        scratch_shapes=[
            pltpu.VMEM((C, H2, W2), jnp.float32),             # pre-flatten activation
            pltpu.VMEM((C, S), jnp.float32),                  # flattened activation
        ],
        compiler_params=pltpu.CompilerParams(
            dimension_semantics=("parallel",)),               # N>=2 -> both TCs on v7x
    )(x, uhs, mw, w_pw)

    return out_flat.reshape(N, C, H2, W2)


# ------------------------------ pure-JAX reference ----------------------------

def _reference(x, w_dw, w_pw):
    """Straightforward XLA reference: matrix upsample + explicit 9-tap conv."""
    N, C, H, W = x.shape
    H2, W2 = 2 * H, 2 * W
    hi = jax.lax.Precision.HIGHEST
    uhT = jnp.asarray(_bilinear_upsample_matrix(H).T)         # (H2, H)
    uw = jnp.asarray(_bilinear_upsample_matrix(W))            # (W, W2)
    up = jnp.einsum('kh,nchw->nckw', uhT, x, precision=hi)
    up = jnp.einsum('nckw,wv->nckv', up, uw, precision=hi)    # (N, C, H2, W2)
    upp = jnp.pad(up, ((0, 0), (0, 0), (1, 1), (1, 1)))
    conv = jnp.zeros_like(up)
    for a in range(3):
        for b in range(3):
            conv = conv + (w_dw[:, a, b][None, :, None, None]
                           * upp[:, :, a:a + H2, b:b + W2])

    def in_lrelu(t):
        m = jnp.mean(t, axis=(2, 3), keepdims=True)
        v = jnp.mean((t - m) ** 2, axis=(2, 3), keepdims=True)
        y = (t - m) * jax.lax.rsqrt(v + _EPS)
        return jnp.where(y >= 0, y, _NEG_SLOPE * y)

    y1 = in_lrelu(conv)
    z = jnp.einsum('oc,nchw->nohw', w_pw, y1, precision=hi)
    return in_lrelu(z)


if __name__ == "__main__":
    key = jax.random.PRNGKey(0)
    kx, kdw, kpw = jax.random.split(key, 3)
    N, C, H, W = 2, 4, 16, 16

    x = jax.random.normal(kx, (N, C, H, W), jnp.float32)
    # setup_weights: Conv2d weight ~ N(0, 0.02); use_bias=False so no biases.
    w_dw = 0.02 * jax.random.normal(kdw, (C, 3, 3), jnp.float32)   # depthwise (C,1,3,3)
    w_pw = 0.02 * jax.random.normal(kpw, (C, C), jnp.float32)      # pointwise (C,C,1,1)

    out = upsample_conv(x, w_dw, w_pw)
    jax.block_until_ready(out)

    ref = _reference(x, w_dw, w_pw)
    assert out.shape == (N, C, 2 * H, 2 * W)
    assert bool(jnp.all(jnp.isfinite(out)))
    assert bool(jnp.allclose(out, ref, atol=5e-2, rtol=5e-2))
    print("KERNEL_OK")
</pallas_src>

<mosaic_0001>
module attributes {stable_mosaic.version = 11 : i64} {
  func.func @_fused_kernel(%arg0: i32, %arg1: memref<1x4x16x16xf32, #tpu.memory_space<vmem>>, %arg2: memref<3x32x16xf32, #tpu.memory_space<vmem>>, %arg3: memref<3x4x16x32xf32, #tpu.memory_space<vmem>>, %arg4: memref<4x4xf32, #tpu.memory_space<vmem>>, %arg5: memref<1x4x1024xf32, #tpu.memory_space<vmem>>, %arg6: memref<4x32x32xf32, #tpu.memory_space<vmem>>, %arg7: memref<4x1024xf32, #tpu.memory_space<vmem>>) attributes {dimension_semantics = [#tpu.dimension_semantics<parallel>], iteration_bounds = array<i64: 2>, scalar_prefetch = 0 : i64, scratch_operands = 2 : i64, tpu.core_type = #tpu.core_type<tc>, window_params = [{transform_indices = @transform_0, window_bounds = array<i64: 1, 4, 16, 16>}, {pipeline_mode = #tpu.pipeline_mode<synchronous>, transform_indices = @transform_1, window_bounds = array<i64: 3, 32, 16>}, {pipeline_mode = #tpu.pipeline_mode<synchronous>, transform_indices = @transform_2, window_bounds = array<i64: 3, 4, 16, 32>}, {pipeline_mode = #tpu.pipeline_mode<synchronous>, transform_indices = @transform_3, window_bounds = array<i64: 4, 4>}, {transform_indices = @transform_4, window_bounds = array<i64: 1, 4, 1024>}]} {
    %c0 = arith.constant 0 : index
    %c0_0 = arith.constant 0 : index
    %c0_1 = arith.constant 0 : index
    %c0_2 = arith.constant 0 : index
    %0 = vector.load %arg1[%c0, %c0_0, %c0_1, %c0_2] : memref<1x4x16x16xf32, #tpu.memory_space<vmem>>, vector<1x4x16x16xf32>
    %1 = vector.shape_cast %0 : vector<1x4x16x16xf32> to vector<4x16x16xf32>
    %cst = arith.constant 0.000000e+00 : f32
    %2 = vector.broadcast %cst : f32 to vector<4x32x32xf32>
    %c0_3 = arith.constant 0 : index
    %c0_4 = arith.constant 0 : index
    %c0_5 = arith.constant 0 : index
    %c0_6 = arith.constant 0 : index
    %3 = vector.load %arg3[%c0_3, %c0_4, %c0_5, %c0_6] : memref<3x4x16x32xf32, #tpu.memory_space<vmem>>, vector<1x4x16x32xf32>
    %4 = vector.shape_cast %3 : vector<1x4x16x32xf32> to vector<4x16x32xf32>
    %cst_7 = arith.constant dense<0.000000e+00> : vector<4x16x32xf32>
    %5 = tpu.matmul %1, %4, %cst_7 {dimension_numbers = #tpu.dot_dimension_numbers<[2], [1], [1], [2], [0, 0, 0, 1, 1, 2], [0], [0]>} : vector<4x16x16xf32>, vector<4x16x32xf32>, vector<4x16x32xf32> -> vector<4x16x32xf32>
    %c0_8 = arith.constant 0 : index
    %c0_9 = arith.constant 0 : index
    %c0_10 = arith.constant 0 : index
    %6 = vector.load %arg2[%c0_8, %c0_9, %c0_10] : memref<3x32x16xf32, #tpu.memory_space<vmem>>, vector<1x32x16xf32>
    %7 = vector.shape_cast %6 : vector<1x32x16xf32> to vector<32x16xf32>
    %8 = vector.shape_cast %7 : vector<32x16xf32> to vector<1x32x16xf32>
    %9 = vector.shape_cast %8 : vector<1x32x16xf32> to vector<1x32x16xf32>
    %10 = vector.broadcast %9 : vector<1x32x16xf32> to vector<4x32x16xf32>
    %cst_11 = arith.constant dense<0.000000e+00> : vector<4x32x32xf32>
    %11 = tpu.matmul %10, %5, %cst_11 {dimension_numbers = #tpu.dot_dimension_numbers<[2], [1], [1], [2], [0, 0, 0, 1, 1, 2], [0], [0]>} : vector<4x32x16xf32>, vector<4x16x32xf32>, vector<4x32x32xf32> -> vector<4x32x32xf32>
    %12 = arith.addf %2, %11 : vector<4x32x32xf32>
    %c1 = arith.constant 1 : index
    %c0_12 = arith.constant 0 : index
    %c0_13 = arith.constant 0 : index
    %c0_14 = arith.constant 0 : index
    %13 = vector.load %arg3[%c1, %c0_12, %c0_13, %c0_14] : memref<3x4x16x32xf32, #tpu.memory_space<vmem>>, vector<1x4x16x32xf32>
    %14 = vector.shape_cast %13 : vector<1x4x16x32xf32> to vector<4x16x32xf32>
    %cst_15 = arith.constant dense<0.000000e+00> : vector<4x16x32xf32>
    %15 = tpu.matmul %1, %14, %cst_15 {dimension_numbers = #tpu.dot_dimension_numbers<[2], [1], [1], [2], [0, 0, 0, 1, 1, 2], [0], [0]>} : vector<4x16x16xf32>, vector<4x16x32xf32>, vector<4x16x32xf32> -> vector<4x16x32xf32>
    %c1_16 = arith.constant 1 : index
    %c0_17 = arith.constant 0 : index
    %c0_18 = arith.constant 0 : index
    %16 = vector.load %arg2[%c1_16, %c0_17, %c0_18] : memref<3x32x16xf32, #tpu.memory_space<vmem>>, vector<1x32x16xf32>
    %17 = vector.shape_cast %16 : vector<1x32x16xf32> to vector<32x16xf32>
    %18 = vector.shape_cast %17 : vector<32x16xf32> to vector<1x32x16xf32>
    %19 = vector.shape_cast %18 : vector<1x32x16xf32> to vector<1x32x16xf32>
    %20 = vector.broadcast %19 : vector<1x32x16xf32> to vector<4x32x16xf32>
    %cst_19 = arith.constant dense<0.000000e+00> : vector<4x32x32xf32>
    %21 = tpu.matmul %20, %15, %cst_19 {dimension_numbers = #tpu.dot_dimension_numbers<[2], [1], [1], [2], [0, 0, 0, 1, 1, 2], [0], [0]>} : vector<4x32x16xf32>, vector<4x16x32xf32>, vector<4x32x32xf32> -> vector<4x32x32xf32>
    %22 = arith.addf %12, %21 : vector<4x32x32xf32>
    %c2 = arith.constant 2 : index
    %c0_20 = arith.constant 0 : index
    %c0_21 = arith.constant 0 : index
    %c0_22 = arith.constant 0 : index
    %23 = vector.load %arg3[%c2, %c0_20, %c0_21, %c0_22] : memref<3x4x16x32xf32, #tpu.memory_space<vmem>>, vector<1x4x16x32xf32>
    %24 = vector.shape_cast %23 : vector<1x4x16x32xf32> to vector<4x16x32xf32>
    %cst_23 = arith.constant dense<0.000000e+00> : vector<4x16x32xf32>
    %25 = tpu.matmul %1, %24, %cst_23 {dimension_numbers = #tpu.dot_dimension_numbers<[2], [1], [1], [2], [0, 0, 0, 1, 1, 2], [0], [0]>} : vector<4x16x16xf32>, vector<4x16x32xf32>, vector<4x16x32xf32> -> vector<4x16x32xf32>
    %c2_24 = arith.constant 2 : index
    %c0_25 = arith.constant 0 : index
    %c0_26 = arith.constant 0 : index
    %26 = vector.load %arg2[%c2_24, %c0_25, %c0_26] : memref<3x32x16xf32, #tpu.memory_space<vmem>>, vector<1x32x16xf32>
    %27 = vector.shape_cast %26 : vector<1x32x16xf32> to vector<32x16xf32>
    %28 = vector.shape_cast %27 : vector<32x16xf32> to vector<1x32x16xf32>
    %29 = vector.shape_cast %28 : vector<1x32x16xf32> to vector<1x32x16xf32>
    %30 = vector.broadcast %29 : vector<1x32x16xf32> to vector<4x32x16xf32>
    %cst_27 = arith.constant dense<0.000000e+00> : vector<4x32x32xf32>
    %31 = tpu.matmul %30, %25, %cst_27 {dimension_numbers = #tpu.dot_dimension_numbers<[2], [1], [1], [2], [0, 0, 0, 1, 1, 2], [0], [0]>} : vector<4x32x16xf32>, vector<4x16x32xf32>, vector<4x32x32xf32> -> vector<4x32x32xf32>
    %32 = arith.addf %22, %31 : vector<4x32x32xf32>
    %c0_28 = arith.constant 0 : index
    %c0_29 = arith.constant 0 : index
    %c0_30 = arith.constant 0 : index
    %33 = vector.load %arg6[%c0_28, %c0_29, %c0_30] : memref<4x32x32xf32, #tpu.memory_space<vmem>>, vector<4x32x32xf32>
    tpu.vector_store %arg6[%c0_28, %c0_29, %c0_30], %32 {strides = array<i32>} : memref<4x32x32xf32, #tpu.memory_space<vmem>>, vector<4x32x32xf32>,
    %c0_31 = arith.constant 0 : index
    %c0_32 = arith.constant 0 : index
    %c0_33 = arith.constant 0 : index
    %34 = vector.load %arg6[%c0_31, %c0_32, %c0_33] : memref<4x32x32xf32, #tpu.memory_space<vmem>>, vector<4x1x32xf32>
    %35 = vector.shape_cast %34 : vector<4x1x32xf32> to vector<4x32xf32>
    %c0_34 = arith.constant 0 : index
    %c0_35 = arith.constant 0 : index
    %36 = vector.load %arg7[%c0_34, %c0_35] : memref<4x1024xf32, #tpu.memory_space<vmem>>, vector<4x32xf32>
    tpu.vector_store %arg7[%c0_34, %c0_35], %35 {strides = array<i32>} : memref<4x1024xf32, #tpu.memory_space<vmem>>, vector<4x32xf32>,
    %c0_36 = arith.constant 0 : index
    %c1_37 = arith.constant 1 : index
    %c0_38 = arith.constant 0 : index
    %37 = vector.load %arg6[%c0_36, %c1_37, %c0_38] : memref<4x32x32xf32, #tpu.memory_space<vmem>>, vector<4x1x32xf32>
    %38 = vector.shape_cast %37 : vector<4x1x32xf32> to vector<4x32xf32>
    %c0_39 = arith.constant 0 : index
    %c32 = arith.constant 32 : index
    %39 = vector.load %arg7[%c0_39, %c32] : memref<4x1024xf32, #tpu.memory_space<vmem>>, vector<4x32xf32>
    tpu.vector_store %arg7[%c0_39, %c32], %38 {strides = array<i32>} : memref<4x1024xf32, #tpu.memory_space<vmem>>, vector<4x32xf32>,
    %c0_40 = arith.constant 0 : index
    %c2_41 = arith.constant 2 : index
    %c0_42 = arith.constant 0 : index
    %40 = vector.load %arg6[%c0_40, %c2_41, %c0_42] : memref<4x32x32xf32, #tpu.memory_space<vmem>>, vector<4x1x32xf32>
    %41 = vector.shape_cast %40 : vector<4x1x32xf32> to vector<4x32xf32>
    %c0_43 = arith.constant 0 : index
    %c64 = arith.constant 64 : index
    %42 = vector.load %arg7[%c0_43, %c64] : memref<4x1024xf32, #tpu.memory_space<vmem>>, vector<4x32xf32>
    tpu.vector_store %arg7[%c0_43, %c64], %41 {strides = array<i32>} : memref<4x1024xf32, #tpu.memory_space<vmem>>, vector<4x32xf32>,
    %c0_44 = arith.constant 0 : index
    %c3 = arith.constant 3 : index
    %c0_45 = arith.constant 0 : index
    %43 = vector.load %arg6[%c0_44, %c3, %c0_45] : memref<4x32x32xf32, #tpu.memory_space<vmem>>, vector<4x1x32xf32>
    %44 = vector.shape_cast %43 : vector<4x1x32xf32> to vector<4x32xf32>
    %c0_46 = arith.constant 0 : index
    %c96 = arith.constant 96 : index
    %45 = vector.load %arg7[%c0_46, %c96] : memref<4x1024xf32, #tpu.memory_space<vmem>>, vector<4x32xf32>
    tpu.vector_store %arg7[%c0_46, %c96], %44 {strides = array<i32>} : memref<4x1024xf32, #tpu.memory_space<vmem>>, vector<4x32xf32>,
    %c0_47 = arith.constant 0 : index
    %c4 = arith.constant 4 : index
    %c0_48 = arith.constant 0 : index
    %46 = vector.load %arg6[%c0_47, %c4, %c0_48] : memref<4x32x32xf32, #tpu.memory_space<vmem>>, vector<4x1x32xf32>
    %47 = vector.shape_cast %46 : vector<4x1x32xf32> to vector<4x32xf32>
    %c0_49 = arith.constant 0 : index
    %c128 = arith.constant 128 : index
    %48 = vector.load %arg7[%c0_49, %c128] : memref<4x1024xf32, #tpu.memory_space<vmem>>, vector<4x32xf32>
    tpu.vector_store %arg7[%c0_49, %c128], %47 {strides = array<i32>} : memref<4x1024xf32, #tpu.memory_space<vmem>>, vector<4x32xf32>,
    %c0_50 = arith.constant 0 : index
    %c5 = arith.constant 5 : index
    %c0_51 = arith.constant 0 : index
    %49 = vector.load %arg6[%c0_50, %c5, %c0_51] : memref<4x32x32xf32, #tpu.memory_space<vmem>>, vector<4x1x32xf32>
    %50 = vector.shape_cast %49 : vector<4x1x32xf32> to vector<4x32xf32>
    %c0_52 = arith.constant 0 : index
    %c160 = arith.constant 160 : index
    %51 = vector.load %arg7[%c0_52, %c160] : memref<4x1024xf32, #tpu.memory_space<vmem>>, vector<4x32xf32>
    tpu.vector_store %arg7[%c0_52, %c160], %50 {strides = array<i32>} : memref<4x1024xf32, #tpu.memory_space<vmem>>, vector<4x32xf32>,
    %c0_53 = arith.constant 0 : index
    %c6 = arith.constant 6 : index
    %c0_54 = arith.constant 0 : index
    %52 = vector.load %arg6[%c0_53, %c6, %c0_54] : memref<4x32x32xf32, #tpu.memory_space<vmem>>, vector<4x1x32xf32>
    %53 = vector.shape_cast %52 : vector<4x1x32xf32> to vector<4x32xf32>
    %c0_55 = arith.constant 0 : index
    %c192 = arith.constant 192 : index
    %54 = vector.load %arg7[%c0_55, %c192] : memref<4x1024xf32, #tpu.memory_space<vmem>>, vector<4x32xf32>
    tpu.vector_store %arg7[%c0_55, %c192], %53 {strides = array<i32>} : memref<4x1024xf32, #tpu.memory_space<vmem>>, vector<4x32xf32>,
    %c0_56 = arith.constant 0 : index
    %c7 = arith.constant 7 : index
    %c0_57 = arith.constant 0 : index
    %55 = vector.load %arg6[%c0_56, %c7, %c0_57] : memref<4x32x32xf32, #tpu.memory_space<vmem>>, vector<4x1x32xf32>
    %56 = vector.shape_cast %55 : vector<4x1x32xf32> to vector<4x32xf32>
    %c0_58 = arith.constant 0 : index
    %c224 = arith.constant 224 : index
    %57 = vector.load %arg7[%c0_58, %c224] : memref<4x1024xf32, #tpu.memory_space<vmem>>, vector<4x32xf32>
    tpu.vector_store %arg7[%c0_58, %c224], %56 {strides = array<i32>} : memref<4x1024xf32, #tpu.memory_space<vmem>>, vector<4x32xf32>,
    %c0_59 = arith.constant 0 : index
    %c8 = arith.constant 8 : index
    %c0_60 = arith.constant 0 : index
    %58 = vector.load %arg6[%c0_59, %c8, %c0_60] : memref<4x32x32xf32, #tpu.memory_space<vmem>>, vector<4x1x32xf32>
    %59 = vector.shape_cast %58 : vector<4x1x32xf32> to vector<4x32xf32>
    %c0_61 = arith.constant 0 : index
    %c256 = arith.constant 256 : index
    %60 = vector.load %arg7[%c0_61, %c256] : memref<4x1024xf32, #tpu.memory_space<vmem>>, vector<4x32xf32>
    tpu.vector_store %arg7[%c0_61, %c256], %59 {strides = array<i32>} : memref<4x1024xf32, #tpu.memory_space<vmem>>, vector<4x32xf32>,
    %c0_62 = arith.constant 0 : index
    %c9 = arith.constant 9 : index
    %c0_63 = arith.constant 0 : index
    %61 = vector.load %arg6[%c0_62, %c9, %c0_63] : memref<4x32x32xf32, #tpu.memory_space<vmem>>, vector<4x1x32xf32>
    %62 = vector.shape_cast %61 : vector<4x1x32xf32> to vector<4x32xf32>
    %c0_64 = arith.constant 0 : index
    %c288 = arith.constant 288 : index
    %63 = vector.load %arg7[%c0_64, %c288] : memref<4x1024xf32, #tpu.memory_space<vmem>>, vector<4x32xf32>
    tpu.vector_store %arg7[%c0_64, %c288], %62 {strides = array<i32>} : memref<4x1024xf32, #tpu.memory_space<vmem>>, vector<4x32xf32>,
    %c0_65 = arith.constant 0 : index
    %c10 = arith.constant 10 : index
    %c0_66 = arith.constant 0 : index
    %64 = vector.load %arg6[%c0_65, %c10, %c0_66] : memref<4x32x32xf32, #tpu.memory_space<vmem>>, vector<4x1x32xf32>
    %65 = vector.shape_cast %64 : vector<4x1x32xf32> to vector<4x32xf32>
    %c0_67 = arith.constant 0 : index
    %c320 = arith.constant 320 : index
    %66 = vector.load %arg7[%c0_67, %c320] : memref<4x1024xf32, #tpu.memory_space<vmem>>, vector<4x32xf32>
    tpu.vector_store %arg7[%c0_67, %c320], %65 {strides = array<i32>} : memref<4x1024xf32, #tpu.memory_space<vmem>>, vector<4x32xf32>,
    %c0_68 = arith.constant 0 : index
    %c11 = arith.constant 11 : index
    %c0_69 = arith.constant 0 : index
    %67 = vector.load %arg6[%c0_68, %c11, %c0_69] : memref<4x32x32xf32, #tpu.memory_space<vmem>>, vector<4x1x32xf32>
    %68 = vector.shape_cast %67 : vector<4x1x32xf32> to vector<4x32xf32>
    %c0_70 = arith.constant 0 : index
    %c352 = arith.constant 352 : index
    %69 = vector.load %arg7[%c0_70, %c352] : memref<4x1024xf32, #tpu.memory_space<vmem>>, vector<4x32xf32>
    tpu.vector_store %arg7[%c0_70, %c352], %68 {strides = array<i32>} : memref<4x1024xf32, #tpu.memory_space<vmem>>, vector<4x32xf32>,
    %c0_71 = arith.constant 0 : index
    %c12 = arith.constant 12 : index
    %c0_72 = arith.constant 0 : index
    %70 = vector.load %arg6[%c0_71, %c12, %c0_72] : memref<4x32x32xf32, #tpu.memory_space<vmem>>, vector<4x1x32xf32>
    %71 = vector.shape_cast %70 : vector<4x1x32xf32> to vector<4x32xf32>
    %c0_73 = arith.constant 0 : index
    %c384 = arith.constant 384 : index
    %72 = vector.load %arg7[%c0_73, %c384] : memref<4x1024xf32, #tpu.memory_space<vmem>>, vector<4x32xf32>
    tpu.vector_store %arg7[%c0_73, %c384], %71 {strides = array<i32>} : memref<4x1024xf32, #tpu.memory_space<vmem>>, vector<4x32xf32>,
    %c0_74 = arith.constant 0 : index
    %c13 = arith.constant 13 : index
    %c0_75 = arith.constant 0 : index
    %73 = vector.load %arg6[%c0_74, %c13, %c0_75] : memref<4x32x32xf32, #tpu.memory_space<vmem>>, vector<4x1x32xf32>
    %74 = vector.shape_cast %73 : vector<4x1x32xf32> to vector<4x32xf32>
    %c0_76 = arith.constant 0 : index
    %c416 = arith.constant 416 : index
    %75 = vector.load %arg7[%c0_76, %c416] : memref<4x1024xf32, #tpu.memory_space<vmem>>, vector<4x32xf32>
    tpu.vector_store %arg7[%c0_76, %c416], %74 {strides = array<i32>} : memref<4x1024xf32, #tpu.memory_space<vmem>>, vector<4x32xf32>,
    %c0_77 = arith.constant 0 : index
    %c14 = arith.constant 14 : index
    %c0_78 = arith.constant 0 : index
    %76 = vector.load %arg6[%c0_77, %c14, %c0_78] : memref<4x32x32xf32, #tpu.memory_space<vmem>>, vector<4x1x32xf32>
    %77 = vector.shape_cast %76 : vector<4x1x32xf32> to vector<4x32xf32>
    %c0_79 = arith.constant 0 : index
    %c448 = arith.constant 448 : index
    %78 = vector.load %arg7[%c0_79, %c448] : memref<4x1024xf32, #tpu.memory_space<vmem>>, vector<4x32xf32>
    tpu.vector_store %arg7[%c0_79, %c448], %77 {strides = array<i32>} : memref<4x1024xf32, #tpu.memory_space<vmem>>, vector<4x32xf32>,
    %c0_80 = arith.constant 0 : index
    %c15 = arith.constant 15 : index
    %c0_81 = arith.constant 0 : index
    %79 = vector.load %arg6[%c0_80, %c15, %c0_81] : memref<4x32x32xf32, #tpu.memory_space<vmem>>, vector<4x1x32xf32>
    %80 = vector.shape_cast %79 : vector<4x1x32xf32> to vector<4x32xf32>
    %c0_82 = arith.constant 0 : index
    %c480 = arith.constant 480 : index
    %81 = vector.load %arg7[%c0_82, %c480] : memref<4x1024xf32, #tpu.memory_space<vmem>>, vector<4x32xf32>
    tpu.vector_store %arg7[%c0_82, %c480], %80 {strides = array<i32>} : memref<4x1024xf32, #tpu.memory_space<vmem>>, vector<4x32xf32>,
    %c0_83 = arith.constant 0 : index
    %c16 = arith.constant 16 : index
    %c0_84 = arith.constant 0 : index
    %82 = vector.load %arg6[%c0_83, %c16, %c0_84] : memref<4x32x32xf32, #tpu.memory_space<vmem>>, vector<4x1x32xf32>
    %83 = vector.shape_cast %82 : vector<4x1x32xf32> to vector<4x32xf32>
    %c0_85 = arith.constant 0 : index
    %c512 = arith.constant 512 : index
    %84 = vector.load %arg7[%c0_85, %c512] : memref<4x1024xf32, #tpu.memory_space<vmem>>, vector<4x32xf32>
    tpu.vector_store %arg7[%c0_85, %c512], %83 {strides = array<i32>} : memref<4x1024xf32, #tpu.memory_space<vmem>>, vector<4x32xf32>,
    %c0_86 = arith.constant 0 : index
    %c17 = arith.constant 17 : index
    %c0_87 = arith.constant 0 : index
    %85 = vector.load %arg6[%c0_86, %c17, %c0_87] : memref<4x32x32xf32, #tpu.memory_space<vmem>>, vector<4x1x32xf32>
    %86 = vector.shape_cast %85 : vector<4x1x32xf32> to vector<4x32xf32>
    %c0_88 = arith.constant 0 : index
    %c544 = arith.constant 544 : index
    %87 = vector.load %arg7[%c0_88, %c544] : memref<4x1024xf32, #tpu.memory_space<vmem>>, vector<4x32xf32>
    tpu.vector_store %arg7[%c0_88, %c544], %86 {strides = array<i32>} : memref<4x1024xf32, #tpu.memory_space<vmem>>, vector<4x32xf32>,
    %c0_89 = arith.constant 0 : index
    %c18 = arith.constant 18 : index
    %c0_90 = arith.constant 0 : index
    %88 = vector.load %arg6[%c0_89, %c18, %c0_90] : memref<4x32x32xf32, #tpu.memory_space<vmem>>, vector<4x1x32xf32>
    %89 = vector.shape_cast %88 : vector<4x1x32xf32> to vector<4x32xf32>
    %c0_91 = arith.constant 0 : index
    %c576 = arith.constant 576 : index
    %90 = vector.load %arg7[%c0_91, %c576] : memref<4x1024xf32, #tpu.memory_space<vmem>>, vector<4x32xf32>
    tpu.vector_store %arg7[%c0_91, %c576], %89 {strides = array<i32>} : memref<4x1024xf32, #tpu.memory_space<vmem>>, vector<4x32xf32>,
    %c0_92 = arith.constant 0 : index
    %c19 = arith.constant 19 : index
    %c0_93 = arith.constant 0 : index
    %91 = vector.load %arg6[%c0_92, %c19, %c0_93] : memref<4x32x32xf32, #tpu.memory_space<vmem>>, vector<4x1x32xf32>
    %92 = vector.shape_cast %91 : vector<4x1x32xf32> to vector<4x32xf32>
    %c0_94 = arith.constant 0 : index
    %c608 = arith.constant 608 : index
    %93 = vector.load %arg7[%c0_94, %c608] : memref<4x1024xf32, #tpu.memory_space<vmem>>, vector<4x32xf32>
    tpu.vector_store %arg7[%c0_94, %c608], %92 {strides = array<i32>} : memref<4x1024xf32, #tpu.memory_space<vmem>>, vector<4x32xf32>,
    %c0_95 = arith.constant 0 : index
    %c20 = arith.constant 20 : index
    %c0_96 = arith.constant 0 : index
    %94 = vector.load %arg6[%c0_95, %c20, %c0_96] : memref<4x32x32xf32, #tpu.memory_space<vmem>>, vector<4x1x32xf32>
    %95 = vector.shape_cast %94 : vector<4x1x32xf32> to vector<4x32xf32>
    %c0_97 = arith.constant 0 : index
    %c640 = arith.constant 640 : index
    %96 = vector.load %arg7[%c0_97, %c640] : memref<4x1024xf32, #tpu.memory_space<vmem>>, vector<4x32xf32>
    tpu.vector_store %arg7[%c0_97, %c640], %95 {strides = array<i32>} : memref<4x1024xf32, #tpu.memory_space<vmem>>, vector<4x32xf32>,
    %c0_98 = arith.constant 0 : index
    %c21 = arith.constant 21 : index
    %c0_99 = arith.constant 0 : index
    %97 = vector.load %arg6[%c0_98, %c21, %c0_99] : memref<4x32x32xf32, #tpu.memory_space<vmem>>, vector<4x1x32xf32>
    %98 = vector.shape_cast %97 : vector<4x1x32xf32> to vector<4x32xf32>
    %c0_100 = arith.constant 0 : index
    %c672 = arith.constant 672 : index
    %99 = vector.load %arg7[%c0_100, %c672] : memref<4x1024xf32, #tpu.memory_space<vmem>>, vector<4x32xf32>
    tpu.vector_store %arg7[%c0_100, %c672], %98 {strides = array<i32>} : memref<4x1024xf32, #tpu.memory_space<vmem>>, vector<4x32xf32>,
    %c0_101 = arith.constant 0 : index
    %c22 = arith.constant 22 : index
    %c0_102 = arith.constant 0 : index
    %100 = vector.load %arg6[%c0_101, %c22, %c0_102] : memref<4x32x32xf32, #tpu.memory_space<vmem>>, vector<4x1x32xf32>
    %101 = vector.shape_cast %100 : vector<4x1x32xf32> to vector<4x32xf32>
    %c0_103 = arith.constant 0 : index
    %c704 = arith.constant 704 : index
    %102 = vector.load %arg7[%c0_103, %c704] : memref<4x1024xf32, #tpu.memory_space<vmem>>, vector<4x32xf32>
    tpu.vector_store %arg7[%c0_103, %c704], %101 {strides = array<i32>} : memref<4x1024xf32, #tpu.memory_space<vmem>>, vector<4x32xf32>,
    %c0_104 = arith.constant 0 : index
    %c23 = arith.constant 23 : index
    %c0_105 = arith.constant 0 : index
    %103 = vector.load %arg6[%c0_104, %c23, %c0_105] : memref<4x32x32xf32, #tpu.memory_space<vmem>>, vector<4x1x32xf32>
    %104 = vector.shape_cast %103 : vector<4x1x32xf32> to vector<4x32xf32>
    %c0_106 = arith.constant 0 : index
    %c736 = arith.constant 736 : index
    %105 = vector.load %arg7[%c0_106, %c736] : memref<4x1024xf32, #tpu.memory_space<vmem>>, vector<4x32xf32>
    tpu.vector_store %arg7[%c0_106, %c736], %104 {strides = array<i32>} : memref<4x1024xf32, #tpu.memory_space<vmem>>, vector<4x32xf32>,
    %c0_107 = arith.constant 0 : index
    %c24 = arith.constant 24 : index
    %c0_108 = arith.constant 0 : index
    %106 = vector.load %arg6[%c0_107, %c24, %c0_108] : memref<4x32x32xf32, #tpu.memory_space<vmem>>, vector<4x1x32xf32>
    %107 = vector.shape_cast %106 : vector<4x1x32xf32> to vector<4x32xf32>
    %c0_109 = arith.constant 0 : index
    %c768 = arith.constant 768 : index
    %108 = vector.load %arg7[%c0_109, %c768] : memref<4x1024xf32, #tpu.memory_space<vmem>>, vector<4x32xf32>
    tpu.vector_store %arg7[%c0_109, %c768], %107 {strides = array<i32>} : memref<4x1024xf32, #tpu.memory_space<vmem>>, vector<4x32xf32>,
    %c0_110 = arith.constant 0 : index
    %c25 = arith.constant 25 : index
    %c0_111 = arith.constant 0 : index
    %109 = vector.load %arg6[%c0_110, %c25, %c0_111] : memref<4x32x32xf32, #tpu.memory_space<vmem>>, vector<4x1x32xf32>
    %110 = vector.shape_cast %109 : vector<4x1x32xf32> to vector<4x32xf32>
    %c0_112 = arith.constant 0 : index
    %c800 = arith.constant 800 : index
    %111 = vector.load %arg7[%c0_112, %c800] : memref<4x1024xf32, #tpu.memory_space<vmem>>, vector<4x32xf32>
    tpu.vector_store %arg7[%c0_112, %c800], %110 {strides = array<i32>} : memref<4x1024xf32, #tpu.memory_space<vmem>>, vector<4x32xf32>,
    %c0_113 = arith.constant 0 : index
    %c26 = arith.constant 26 : index
    %c0_114 = arith.constant 0 : index
    %112 = vector.load %arg6[%c0_113, %c26, %c0_114] : memref<4x32x32xf32, #tpu.memory_space<vmem>>, vector<4x1x32xf32>
    %113 = vector.shape_cast %112 : vector<4x1x32xf32> to vector<4x32xf32>
    %c0_115 = arith.constant 0 : index
    %c832 = arith.constant 832 : index
    %114 = vector.load %arg7[%c0_115, %c832] : memref<4x1024xf32, #tpu.memory_space<vmem>>, vector<4x32xf32>
    tpu.vector_store %arg7[%c0_115, %c832], %113 {strides = array<i32>} : memref<4x1024xf32, #tpu.memory_space<vmem>>, vector<4x32xf32>,
    %c0_116 = arith.constant 0 : index
    %c27 = arith.constant 27 : index
    %c0_117 = arith.constant 0 : index
    %115 = vector.load %arg6[%c0_116, %c27, %c0_117] : memref<4x32x32xf32, #tpu.memory_space<vmem>>, vector<4x1x32xf32>
    %116 = vector.shape_cast %115 : vector<4x1x32xf32> to vector<4x32xf32>
    %c0_118 = arith.constant 0 : index
    %c864 = arith.constant 864 : index
    %117 = vector.load %arg7[%c0_118, %c864] : memref<4x1024xf32, #tpu.memory_space<vmem>>, vector<4x32xf32>
    tpu.vector_store %arg7[%c0_118, %c864], %116 {strides = array<i32>} : memref<4x1024xf32, #tpu.memory_space<vmem>>, vector<4x32xf32>,
    %c0_119 = arith.constant 0 : index
    %c28 = arith.constant 28 : index
    %c0_120 = arith.constant 0 : index
    %118 = vector.load %arg6[%c0_119, %c28, %c0_120] : memref<4x32x32xf32, #tpu.memory_space<vmem>>, vector<4x1x32xf32>
    %119 = vector.shape_cast %118 : vector<4x1x32xf32> to vector<4x32xf32>
    %c0_121 = arith.constant 0 : index
    %c896 = arith.constant 896 : index
    %120 = vector.load %arg7[%c0_121, %c896] : memref<4x1024xf32, #tpu.memory_space<vmem>>, vector<4x32xf32>
    tpu.vector_store %arg7[%c0_121, %c896], %119 {strides = array<i32>} : memref<4x1024xf32, #tpu.memory_space<vmem>>, vector<4x32xf32>,
    %c0_122 = arith.constant 0 : index
    %c29 = arith.constant 29 : index
    %c0_123 = arith.constant 0 : index
    %121 = vector.load %arg6[%c0_122, %c29, %c0_123] : memref<4x32x32xf32, #tpu.memory_space<vmem>>, vector<4x1x32xf32>
    %122 = vector.shape_cast %121 : vector<4x1x32xf32> to vector<4x32xf32>
    %c0_124 = arith.constant 0 : index
    %c928 = arith.constant 928 : index
    %123 = vector.load %arg7[%c0_124, %c928] : memref<4x1024xf32, #tpu.memory_space<vmem>>, vector<4x32xf32>
    tpu.vector_store %arg7[%c0_124, %c928], %122 {strides = array<i32>} : memref<4x1024xf32, #tpu.memory_space<vmem>>, vector<4x32xf32>,
    %c0_125 = arith.constant 0 : index
    %c30 = arith.constant 30 : index
    %c0_126 = arith.constant 0 : index
    %124 = vector.load %arg6[%c0_125, %c30, %c0_126] : memref<4x32x32xf32, #tpu.memory_space<vmem>>, vector<4x1x32xf32>
    %125 = vector.shape_cast %124 : vector<4x1x32xf32> to vector<4x32xf32>
    %c0_127 = arith.constant 0 : index
    %c960 = arith.constant 960 : index
    %126 = vector.load %arg7[%c0_127, %c960] : memref<4x1024xf32, #tpu.memory_space<vmem>>, vector<4x32xf32>
    tpu.vector_store %arg7[%c0_127, %c960], %125 {strides = array<i32>} : memref<4x1024xf32, #tpu.memory_space<vmem>>, vector<4x32xf32>,
    %c0_128 = arith.constant 0 : index
    %c31 = arith.constant 31 : index
    %c0_129 = arith.constant 0 : index
    %127 = vector.load %arg6[%c0_128, %c31, %c0_129] : memref<4x32x32xf32, #tpu.memory_space<vmem>>, vector<4x1x32xf32>
    %128 = vector.shape_cast %127 : vector<4x1x32xf32> to vector<4x32xf32>
    %c0_130 = arith.constant 0 : index
    %c992 = arith.constant 992 : index
    %129 = vector.load %arg7[%c0_130, %c992] : memref<4x1024xf32, #tpu.memory_space<vmem>>, vector<4x32xf32>
    tpu.vector_store %arg7[%c0_130, %c992], %128 {strides = array<i32>} : memref<4x1024xf32, #tpu.memory_space<vmem>>, vector<4x32xf32>,
    %c0_131 = arith.constant 0 : index
    %c0_132 = arith.constant 0 : index
    %130 = vector.load %arg7[%c0_131, %c0_132] : memref<4x1024xf32, #tpu.memory_space<vmem>>, vector<4x1024xf32>
    %cst_133 = arith.constant dense<0.000000e+00> : vector<4xf32>
    %131 = vector.multi_reduction <add>, %130, %cst_133 [1] : vector<4x1024xf32> to vector<4xf32>
    %132 = vector.shape_cast %131 : vector<4xf32> to vector<4x1xf32>
    %133 = arith.mulf %130, %130 : vector<4x1024xf32>
    %cst_134 = arith.constant dense<0.000000e+00> : vector<4xf32>
    %134 = vector.multi_reduction <add>, %133, %cst_134 [1] : vector<4x1024xf32> to vector<4xf32>
    %135 = vector.shape_cast %134 : vector<4xf32> to vector<4x1xf32>
    %cst_135 = arith.constant 9.765625E-4 : f32
    %136 = vector.broadcast %cst_135 : f32 to vector<4x1xf32>
    %137 = arith.mulf %132, %136 : vector<4x1xf32>
    %cst_136 = arith.constant 9.765625E-4 : f32
    %138 = vector.broadcast %cst_136 : f32 to vector<4x1xf32>
    %139 = arith.mulf %135, %138 : vector<4x1xf32>
    %140 = arith.mulf %137, %137 : vector<4x1xf32>
    %141 = arith.subf %139, %140 : vector<4x1xf32>
    %cst_137 = arith.constant 0.000000e+00 : f32
    %142 = vector.broadcast %cst_137 : f32 to vector<4x1xf32>
    %143 = arith.maximumf %141, %142 : vector<4x1xf32>
    %144 = vector.broadcast %137 : vector<4x1xf32> to vector<4x1024xf32>
    %145 = arith.subf %130, %144 : vector<4x1024xf32>
    %cst_138 = arith.constant 9.99999974E-6 : f32
    %146 = vector.broadcast %cst_138 : f32 to vector<4x1xf32>
    %147 = arith.addf %143, %146 : vector<4x1xf32>
    %148 = math.rsqrt %147 : vector<4x1xf32>
    %149 = vector.broadcast %148 : vector<4x1xf32> to vector<4x1024xf32>
    %150 = arith.mulf %145, %149 : vector<4x1024xf32>
    %cst_139 = arith.constant 0.000000e+00 : f32
    %151 = vector.broadcast %cst_139 : f32 to vector<4x1024xf32>
    %152 = arith.cmpf oge, %150, %151 : vector<4x1024xf32>
    %cst_140 = arith.constant 2.000000e-01 : f32
    %153 = vector.broadcast %cst_140 : f32 to vector<4x1024xf32>
    %154 = arith.mulf %153, %150 : vector<4x1024xf32>
    %155 = arith.select %152, %150, %154 : vector<4x1024xi1>, vector<4x1024xf32>
    %c0_141 = arith.constant 0 : index
    %c0_142 = arith.constant 0 : index
    %156 = vector.load %arg4[%c0_141, %c0_142] : memref<4x4xf32, #tpu.memory_space<vmem>>, vector<4x4xf32>
    %cst_143 = arith.constant dense<0.000000e+00> : vector<4x1024xf32>
    %157 = tpu.matmul %156, %155, %cst_143 {dimension_numbers = #tpu.dot_dimension_numbers<[1], [0], [0], [1], [0, 0, 1, 1], [], []>} : vector<4x4xf32>, vector<4x1024xf32>, vector<4x1024xf32> -> vector<4x1024xf32>
    %cst_144 = arith.constant dense<0.000000e+00> : vector<4xf32>
    %158 = vector.multi_reduction <add>, %157, %cst_144 [1] : vector<4x1024xf32> to vector<4xf32>
    %159 = vector.shape_cast %158 : vector<4xf32> to vector<4x1xf32>
    %160 = arith.mulf %157, %157 : vector<4x1024xf32>
    %cst_145 = arith.constant dense<0.000000e+00> : vector<4xf32>
    %161 = vector.multi_reduction <add>, %160, %cst_145 [1] : vector<4x1024xf32> to vector<4xf32>
    %162 = vector.shape_cast %161 : vector<4xf32> to vector<4x1xf32>
    %cst_146 = arith.constant 9.765625E-4 : f32
    %163 = vector.broadcast %cst_146 : f32 to vector<4x1xf32>
    %164 = arith.mulf %159, %163 : vector<4x1xf32>
    %cst_147 = arith.constant 9.765625E-4 : f32
    %165 = vector.broadcast %cst_147 : f32 to vector<4x1xf32>
    %166 = arith.mulf %162, %165 : vector<4x1xf32>
    %167 = arith.mulf %164, %164 : vector<4x1xf32>
    %168 = arith.subf %166, %167 : vector<4x1xf32>
    %cst_148 = arith.constant 0.000000e+00 : f32
    %169 = vector.broadcast %cst_148 : f32 to vector<4x1xf32>
    %170 = arith.maximumf %168, %169 : vector<4x1xf32>
    %171 = vector.broadcast %164 : vector<4x1xf32> to vector<4x1024xf32>
    %172 = arith.subf %157, %171 : vector<4x1024xf32>
    %cst_149 = arith.constant 9.99999974E-6 : f32
    %173 = vector.broadcast %cst_149 : f32 to vector<4x1xf32>
    %174 = arith.addf %170, %173 : vector<4x1xf32>
    %175 = math.rsqrt %174 : vector<4x1xf32>
    %176 = vector.broadcast %175 : vector<4x1xf32> to vector<4x1024xf32>
    %177 = arith.mulf %172, %176 : vector<4x1024xf32>
    %cst_150 = arith.constant 0.000000e+00 : f32
    %178 = vector.broadcast %cst_150 : f32 to vector<4x1024xf32>
    %179 = arith.cmpf oge, %177, %178 : vector<4x1024xf32>
    %cst_151 = arith.constant 2.000000e-01 : f32
    %180 = vector.broadcast %cst_151 : f32 to vector<4x1024xf32>
    %181 = arith.mulf %180, %177 : vector<4x1024xf32>
    %182 = arith.select %179, %177, %181 : vector<4x1024xi1>, vector<4x1024xf32>
    %c0_152 = arith.constant 0 : index
    %c0_153 = arith.constant 0 : index
    %c0_154 = arith.constant 0 : index
    %183 = vector.load %arg5[%c0_152, %c0_153, %c0_154] : memref<1x4x1024xf32, #tpu.memory_space<vmem>>, vector<1x4x1024xf32>
    %184 = vector.shape_cast %183 : vector<1x4x1024xf32> to vector<4x1024xf32>
    %185 = vector.shape_cast %182 : vector<4x1024xf32> to vector<1x4x1024xf32>
    tpu.vector_store %arg5[%c0_152, %c0_153, %c0_154], %185 {strides = array<i32>} : memref<1x4x1024xf32, #tpu.memory_space<vmem>>, vector<1x4x1024xf32>,
    return
  }
  func.func @transform_0(%arg0: i32) -> (i32, i32, i32, i32) {
    %c0_i32 = arith.constant 0 : i32
    %c0_i32_0 = arith.constant 0 : i32
    %c0_i32_1 = arith.constant 0 : i32
    %c0_i32_2 = arith.constant 0 : i32
    return %arg0, %c0_i32, %c0_i32_0, %c0_i32_1 : i32, i32, i32, i32
  }
  func.func @transform_1(%arg0: i32) -> (i32, i32, i32) {
    %c0_i32 = arith.constant 0 : i32
    %c0_i32_0 = arith.constant 0 : i32
    %c0_i32_1 = arith.constant 0 : i32
    %c0_i32_2 = arith.constant 0 : i32
    return %c0_i32, %c0_i32_0, %c0_i32_1 : i32, i32, i32
  }
  func.func @transform_2(%arg0: i32) -> (i32, i32, i32, i32) {
    %c0_i32 = arith.constant 0 : i32
    %c0_i32_0 = arith.constant 0 : i32
    %c0_i32_1 = arith.constant 0 : i32
    %c0_i32_2 = arith.constant 0 : i32
    %c0_i32_3 = arith.constant 0 : i32
    return %c0_i32, %c0_i32_0, %c0_i32_1, %c0_i32_2 : i32, i32, i32, i32
  }
  func.func @transform_3(%arg0: i32) -> (i32, i32) {
    %c0_i32 = arith.constant 0 : i32
    %c0_i32_0 = arith.constant 0 : i32
    %c0_i32_1 = arith.constant 0 : i32
    return %c0_i32, %c0_i32_0 : i32, i32
  }
  func.func @transform_4(%arg0: i32) -> (i32, i32, i32) {
    %c0_i32 = arith.constant 0 : i32
    %c0_i32_0 = arith.constant 0 : i32
    %c0_i32_1 = arith.constant 0 : i32
    return %arg0, %c0_i32, %c0_i32_0 : i32, i32, i32
  }
}

</mosaic_0001>

<bundles_post_ra>
// kernel: upsample_conv.1
= control target key start
LH: loop header
LB: loop body
LE: loop exit
PB: predicated region body
PF: predicated region fallthrough
CT: control target
= control target key end

     0   :  { %s4147_s15 = smov 0   ;;  %s4744_s0 = inlined_call_operand.vmem [shape: f32[2,4,16,16], index: 0, kind: input, shape index: {}]   ;;  %s4745_s1 = inlined_call_operand.vmem [shape: f32[3,32,16], index: 1, kind: input, shape index: {}]   ;;  %s4746_s2 = inlined_call_operand.vmem [shape: f32[3,4,16,32], index: 2, kind: input, shape index: {}]   ;;  %s4747_s3 = inlined_call_operand.vmem [shape: f32[4,4], index: 3, kind: input, shape index: {}]   ;;  %s4748_s4 = inlined_call_operand.vmem [shape: f32[2,4,1024], index: 4, kind: output, shape index: {}]  }
   0x1 LB: > { %s3515_s16 = sadd.s32 4294967295, %s4115_s15   ;;  %p3519_p0 = scmp.ge.s32.totalorder %s4115_s15, 1  ;;  %s4115_s15 = sphi %s4147_s15, %s14_s15  }
   0x2   : > { %p162_p1 = scmp.lt.s32.totalorder %s4115_s15, 3 }
   0x4   : > { %p163_p2 = pnand %p3519_p0, %p162_p1 }
   0x5   : > { %v206_v0 = vld [vmem:[%s4746_s2] sm:$0xff] (!%p163_p2)  ;;  %v207_v1 = vld [vmem:[%s4746_s2 + $0x8] sm:$0xff] (!%p163_p2)  ;;  %v208_v2 = vld [vmem:[%s4746_s2 + $0x10] sm:$0xff] (!%p163_p2)  ;;  %p188_p3 = scmp.lt.s32.totalorder (!%p163_p2), %s3515_s16, 1  ;;  %vm214_vm0 = vcmask (!%p163_p2), 130048   ;;  %vm2243_vm1 = vcmask (!%p163_p2), 261120  }
   0x6   : > { %166 = sbr.rel (%p163_p2) target bundleno = 1486 (0x5ce), region = 36  ;;  %v3960_v3 = vpack.c.bf16 (!%p163_p2), %v207_v1, %v206_v0  ;;  %v209_v4 = vld [vmem:[%s4746_s2 + $0x18] sm:$0xff] (!%p163_p2)  ;;  %v210_v5 = vld [vmem:[%s4746_s2 + $0x20] sm:$0xff] (!%p163_p2)  ;;  %v211_v6 = vld [vmem:[%s4746_s2 + $0x28] sm:$0xff] (!%p163_p2)  ;;  %vm2269_vm2 = vcmask (!%p163_p2), 1041409   ;;  %vm2271_vm3 = vcmask (!%p163_p2), 1045509  }
   0x7   : > { %v3964_v7 = vpack.c.bf16 (!%p163_p2), %v209_v4, %v208_v2  ;;  %v3968_v8 = vpack.c.bf16 (!%p163_p2), %v211_v6, %v210_v5  ;;  %v212_v9 = vld [vmem:[%s4746_s2 + $0x30] sm:$0xff] (!%p163_p2)  ;;  %v213_v10 = vld [vmem:[%s4746_s2 + $0x38] sm:$0xff] (!%p163_p2)  ;;  %v3532_v12 = vld [vmem:[%s4746_s2 + $0x40] sm:$0xff] (!%p163_p2)  ;;  %vm2274_vm4 = vcmask (!%p163_p2), 1042434   ;;  %vm2276_vm5 = vcmask (!%p163_p2), 1046534   ;;  %s4117_s21 = smov (!%p163_p2), 32  }
   0x8   : > { %3961 = vmatprep.subr.bf16.mxu0 (!%p163_p2), %v3960_v3  ;;  %v3972_v11 = vpack.c.bf16 (!%p163_p2), %v213_v10, %v212_v9  ;;  %v3533_v13 = vld [vmem:[%s4746_s2 + $0x48] sm:$0xff] (!%p163_p2)  ;;  %v3534_v14 = vld [vmem:[%s4746_s2 + $0x50] sm:$0xff] (!%p163_p2)  ;;  %v3535_v15 = vld [vmem:[%s4746_s2 + $0x58] sm:$0xff] (!%p163_p2)  ;;  %vm2279_vm6 = vcmask (!%p163_p2), 1043459   ;;  %vm2281_vm7 = vcmask (!%p163_p2), 1047559   ;;  %s4118_s22 = smov (!%p163_p2), 64  }
   0x9   : > { %3965 = vmatprep.subr.bf16.mxu1 (!%p163_p2), %v3964_v7  ;;  %3963 = vmatpush3.bf16.msra.mxu0 (!%p163_p2), %v3960_v3  ;;  %v3536_v19 = vld [vmem:[%s4746_s2 + $0x60] sm:$0xff] (!%p163_p2)  ;;  %v3976_v23 = vpack.c.bf16 (!%p163_p2), %v3533_v13, %v3532_v12  ;;  %v3980_v24 = vpack.c.bf16 (!%p163_p2), %v3535_v15, %v3534_v14  ;;  %v3537_v25 = vld [vmem:[%s4746_s2 + $0x68] sm:$0xff] (!%p163_p2)  ;;  %v3538_v26 = vld [vmem:[%s4746_s2 + $0x70] sm:$0xff] (!%p163_p2)  ;;  %s4119_s23 = smov (!%p163_p2), 96   ;;  %vm2284_vm8 = vcmask (!%p163_p2), 257024   ;;  %vm2306_vm9 = vcmask (!%p163_p2), 519424  }
   0xa   : > { %3967 = vmatpush3.bf16.msra.mxu1 (!%p163_p2), %v3964_v7  ;;  %3969 = vmatprep.subr.bf16.mxu0 (!%p163_p2), %v3968_v8  ;;  %v3539_v27 = vld [vmem:[%s4746_s2 + $0x78] sm:$0xff] (!%p163_p2)  ;;  %v3984_v30 = vpack.c.bf16 (!%p163_p2), %v3537_v25, %v3536_v19  ;;  %v3548_v32 = vld [vmem:[%s4745_s1 + $0x20] sm:$0xff] (!%p163_p2)  ;;  %v3549_v55 = vld [vmem:[%s4745_s1 + $0x28] sm:$0xff] (!%p163_p2)  ;;  %vm2328_vm10 = vcmask (!%p163_p2), 781824   ;;  %vm2350_vm11 = vcmask (!%p163_p2), 1044224   ;;  %vm2942_vm12 = vcmask (!%p163_p2), 1043456  }
   0xb   : > { %3973 = vmatprep.subr.bf16.mxu1 (!%p163_p2), %v3972_v11  ;;  %v3988_v31 = vpack.c.bf16 (!%p163_p2), %v3539_v27, %v3538_v26  ;;  %v3550_v58 = vld [vmem:[%s4745_s1 + $0x30] sm:$0xff] (!%p163_p2)  ;;  %v3551_v59 = vld [vmem:[%s4745_s1 + $0x38] sm:$0xff] (!%p163_p2)  ;;  %v539_v60 = vld [vmem:[%s4745_s1] sm:$0xff] (!%p163_p2) }
   0xc   : > { %v3584_v61 = vld [vmem:[%s4746_s2 + $0x80] sm:$0xff] (!%p163_p2)  ;;  %v3585_v62 = vld [vmem:[%s4746_s2 + $0x88] sm:$0xff] (!%p163_p2)  ;;  %v3586_v63 = vld [vmem:[%s4746_s2 + $0x90] sm:$0xff] (!%p163_p2) }
   0xd   : > { %s4750_s16 = smov (!%p188_p3, %s3515_s16), 1  ;;  %v3587_v0 = vld [vmem:[%s4746_s2 + $0x98] sm:$0xff]  ;;  %v540_v1 = vld [vmem:[%s4745_s1 + $0x8] sm:$0xff]  ;;  %v541_v2 = vld [vmem:[%s4745_s1 + $0x10] sm:$0xff]  ;;  %v4024_v3 = vpack.c.bf16 %v3585_v62, %v3584_v61 }
   0xe   : > { %s3634_s9 = sshll.u32 %s4750_s16, 6  ;;  %v4028_v4 = vpack.c.bf16 %v3587_v0, %v3586_v63  ;;  %v542_v5 = vld [vmem:[%s4745_s1 + $0x18] sm:$0xff]  ;;  %v3588_v6 = vld [vmem:[%s4746_s2 + $0xa0] sm:$0xff]  ;;  %v3589_v7 = vld [vmem:[%s4746_s2 + $0xa8] sm:$0xff]  ;;  %s3635_s26 = sshll.u32 %s4750_s16, 5 }
   0xf   : > { %s192_s20 = scalar_lea.vmem %s4744_s0, %s3634_s9  ;;  %v3591_v9 = vld [vmem:[%s4746_s2 + $0xb8] sm:$0xff]  ;;  %v4032_v10 = vpack.c.bf16 %v3589_v7, %v3588_v6  ;;  %v3600_v12 = vld [vmem:[%s4745_s1 + $0x40] sm:$0xff]  ;;  %v3602_v25 = vld [vmem:[%s4745_s1 + $0x50] sm:$0xff]  ;;  %s197_s16 = scalar_lea.vmem %s4748_s4, %s3635_s26 }
  0x10   : > { %v4197_v16 = vld [vmem:[%s192_s20] sm:$0xff]  ;;  %v4199_v17 = vld [vmem:[%s192_s20 + $0x10] sm:$0xff]  ;;  %v4201_v18 = vld [vmem:[%s192_s20 + $0x8] sm:$0xff] }
  0x11   : > { %3760 = vmatprep.mubr.msk.f32.mxu0 %vm214_vm0, %v4197_v16  ;;  %3767 = vmatprep.mubr.msk.f32.mxu1 %vm214_vm0, %v4199_v17  ;;  %v4210_v20 = vld [vmem:[%s192_s20 + $0x18] sm:$0xff]  ;;  %v4212_v21 = vld [vmem:[%s192_s20 + $0x20] sm:$0xff]  ;;  %v4214_v22 = vld [vmem:[%s192_s20 + $0x30] sm:$0xff] }
  0x12   : > { %3761 = vmatmul.mubr.msk.f32.vlgmr.msra.gmra.mrb[0].mxu0 %vm214_vm0, %v4201_v18  ;;  %3768 = vmatmul.mubr.msk.f32.vlgmr.msra.gmra.mrb[0].mxu1 %vm214_vm0, %v4210_v20  ;;  %v4229_v28 = vld [vmem:[%s192_s20 + $0x28] sm:$0xff]  ;;  %v4231_v29 = vld [vmem:[%s192_s20 + $0x38] sm:$0xff] }
  0x13   : > { %3971 = vmatpush3.bf16.msra.mxu0 %v3968_v8  ;;  %3975 = vmatpush3.bf16.msra.mxu1 %v3972_v11  ;;  %v3590_v8 = vld [vmem:[%s4746_s2 + $0xb0] sm:$0xff]  ;;  %v3603_v27 = vld [vmem:[%s4745_s1 + $0x58] sm:$0xff] }
  0x14   : > { %3774 = vmatprep.mubr.msk.f32.mxu0 %vm214_vm0, %v4212_v21  ;;  %3781 = vmatprep.mubr.msk.f32.mxu1 %vm214_vm0, %v4214_v22  ;;  %v4036_v11 = vpack.c.bf16 %v3591_v9, %v3590_v8 }
  0x15   : > { %3977 = vmatprep.subr.bf16.mxu0 %v3976_v23  ;;  %3981 = vmatprep.subr.bf16.mxu1 %v3980_v24 }
  0x16   : > { %3775 = vmatmul.mubr.msk.f32.vlgmr.msra.gmra.mrb[2].mxu0 %vm214_vm0, %v4229_v28  ;;  %3782 = vmatmul.mubr.msk.f32.vlgmr.msra.gmra.mrb[2].mxu1 %vm214_vm0, %v4231_v29 }
  0x17   : > { %3979 = vmatpush3.bf16.msra.mxu0 %v3976_v23  ;;  %3983 = vmatpush3.bf16.msra.mxu1 %v3980_v24 }
  0x18   : > { %3788 = vmatprep.mubr.msk.f32.mxu0 %vm214_vm0, %v4197_v16  ;;  %3795 = vmatprep.mubr.msk.f32.mxu1 %vm214_vm0, %v4199_v17 }
  0x19   : > { %3985 = vmatprep.subr.bf16.mxu0 %v3984_v30  ;;  %3989 = vmatprep.subr.bf16.mxu1 %v3988_v31 }
  0x1a   : > { %3789 = vmatmul.mubr.msk.f32.vlgmr.msra.gmra.mrb[4].mxu0 %vm214_vm0, %v4201_v18  ;;  %3796 = vmatmul.mubr.msk.f32.vlgmr.msra.gmra.mrb[4].mxu1 %vm214_vm0, %v4210_v20 }
  0x1b   : > { %3987 = vmatpush3.bf16.msra.mxu0 %v3984_v30  ;;  %3991 = vmatpush3.bf16.msra.mxu1 %v3988_v31 }
  0x1c   : > { %3802 = vmatprep.mubr.msk.f32.mxu0 %vm214_vm0, %v4212_v21  ;;  %3809 = vmatprep.mubr.msk.f32.mxu1 %vm214_vm0, %v4214_v22 }
  0x1e   : > { %3803 = vmatmul.mubr.msk.f32.vlgmr.msra.gmra.mrb[6].mxu0 %vm214_vm0, %v4229_v28  ;;  %3810 = vmatmul.mubr.msk.f32.vlgmr.msra.gmra.mrb[6].mxu1 %vm214_vm0, %v4231_v29 }
  0x1f   : > { %3816 = vmatprep.mubr.msk.f32.mxu0 %vm214_vm0, %v3548_v32  ;;  %3826 = vmatprep.mubr.msk.f32.mxu1 %vm214_vm0, %v3548_v32 }
  0xe5   : > { %v3762_v33 = vpop.f32.mrb[0].mxu0  ;;  %v3769_v34 = vpop.f32.mrb[0].mxu1 }
  0xe6   : > { %v287_v35 = vpop.f32.mrb[1].mxu0  ;;  %v368_v36 = vpop.f32.mrb[1].mxu1 }
  0xe7   : > { %v4008_v37 = vpack.c.bf16 %v3762_v33, %v287_v35  ;;  %v4012_v38 = vpack.c.bf16 %v3769_v34, %v368_v36 }
  0xe9   : > { %v3776_v39 = vpop.f32.mrb[2].mxu0  ;;  %v3783_v40 = vpop.f32.mrb[2].mxu1 }
  0xea   : > { %v449_v41 = vpop.f32.mrb[3].mxu0  ;;  %v530_v42 = vpop.f32.mrb[3].mxu1 }
  0xeb   : > { %v4016_v43 = vpack.c.bf16 %v3776_v39, %v449_v41  ;;  %v4020_v44 = vpack.c.bf16 %v3783_v40, %v530_v42 }
  0xed   : > { %v3790_v45 = vpop.f32.mrb[4].mxu0  ;;  %v3797_v46 = vpop.f32.mrb[4].mxu1 }
  0xee   : > { %v618_v47 = vpop.f32.mrb[5].mxu0  ;;  %v693_v48 = vpop.f32.mrb[5].mxu1 }
  0xef   : > { %v3992_v49 = vpack.c.bf16 %v3790_v45, %v618_v47  ;;  %v3996_v50 = vpack.c.bf16 %v3797_v46, %v693_v48 }
  0xf1   : > { %v3804_v51 = vpop.f32.mrb[6].mxu0  ;;  %v3811_v52 = vpop.f32.mrb[6].mxu1  ;;  %3993 = vmatprep.subr.bf16.mxu0 %v3992_v49  ;;  %3997 = vmatprep.subr.bf16.mxu1 %v3996_v50 }
  0xf2   : > { %v768_v53 = vpop.f32.mrb[7].mxu0  ;;  %v843_v54 = vpop.f32.mrb[7].mxu1  ;;  %3995 = vmatpush3.bf16.msra.mxu0 %v3992_v49  ;;  %3999 = vmatpush3.bf16.msra.mxu1 %v3996_v50 }
  0xf3   : > { %v4000_v56 = vpack.c.bf16 %v3804_v51, %v768_v53  ;;  %v4004_v57 = vpack.c.bf16 %v3811_v52, %v843_v54 }
  0xf5   : > { %3817 = vmatmul.mubr.msk.f32.vlgmr.msra.gmra.mrb[8].mxu0 %vm214_vm0, %v3549_v55  ;;  %3827 = vmatmul.mubr.msk.f32.vlgmr.msra.gmra.mrb[8].mxu1 %vm214_vm0, %v3549_v55 }
  0xf6   : > { %4001 = vmatprep.subr.bf16.mxu0 %v4000_v56  ;;  %4005 = vmatprep.subr.bf16.mxu1 %v4004_v57 }
  0xf7   : > { %4003 = vmatpush3.bf16.msra.mxu0 %v4000_v56  ;;  %4007 = vmatpush3.bf16.msra.mxu1 %v4004_v57 }
  0xf8   : > { %4009 = vmatprep.subr.bf16.mxu0 %v4008_v37  ;;  %4013 = vmatprep.subr.bf16.mxu1 %v4012_v38 }
  0xf9   : > { %3819 = vmatprep.mubr.msk.f32.mxu0 %vm214_vm0, %v3550_v58  ;;  %3829 = vmatprep.mubr.msk.f32.mxu1 %vm214_vm0, %v3550_v58 }
  0xfa   : > { %3820 = vmatmul.mubr.msk.f32.gmra.mrb[10].mxu0 %vm214_vm0, %v3551_v59  ;;  %3830 = vmatmul.mubr.msk.f32.gmra.mrb[10].mxu1 %vm214_vm0, %v3551_v59 }
  0xfb   : > { %3836 = vmatprep.mubr.msk.f32.mxu0 %vm214_vm0, %v3548_v32  ;;  %3846 = vmatprep.mubr.msk.f32.mxu1 %vm214_vm0, %v3548_v32 }
  0xfe   : > { %3837 = vmatmul.mubr.msk.f32.vlgmr.msra.gmra.mrb[12].mxu0 %vm214_vm0, %v3549_v55  ;;  %3847 = vmatmul.mubr.msk.f32.vlgmr.msra.gmra.mrb[12].mxu1 %vm214_vm0, %v3549_v55 }
  0xff   : > { %4011 = vmatpush3.bf16.msra.mxu0 %v4008_v37  ;;  %4015 = vmatpush3.bf16.msra.mxu1 %v4012_v38 }
 0x100   : > { %4017 = vmatprep.subr.bf16.mxu0 %v4016_v43  ;;  %4021 = vmatprep.subr.bf16.mxu1 %v4020_v44 }
 0x101   : > { %3839 = vmatprep.mubr.msk.f32.mxu0 %vm214_vm0, %v3550_v58  ;;  %3849 = vmatprep.mubr.msk.f32.mxu1 %vm214_vm0, %v3550_v58 }
 0x102   : > { %3840 = vmatmul.mubr.msk.f32.gmra.mrb[14].mxu0 %vm214_vm0, %v3551_v59  ;;  %3850 = vmatmul.mubr.msk.f32.gmra.mrb[14].mxu1 %vm214_vm0, %v3551_v59 }
 0x103   : > { %3856 = vmatprep.mubr.msk.f32.mxu0 %vm214_vm0, %v539_v60  ;;  %3866 = vmatprep.mubr.msk.f32.mxu1 %vm214_vm0, %v539_v60 }
 0x106   : > { %3857 = vmatmul.mubr.msk.f32.vlgmr.msra.gmra.mrb[8].mxu0 %vm214_vm0, %v540_v1  ;;  %3867 = vmatmul.mubr.msk.f32.vlgmr.msra.gmra.mrb[8].mxu1 %vm214_vm0, %v540_v1 }
 0x107   : > { %4019 = vmatpush3.bf16.msra.mxu0 %v4016_v43  ;;  %4023 = vmatpush3.bf16.msra.mxu1 %v4020_v44 }
 0x108   : > { %3859 = vmatprep.mubr.msk.f32.mxu0 %vm214_vm0, %v541_v2  ;;  %3869 = vmatprep.mubr.msk.f32.mxu1 %vm214_vm0, %v541_v2 }
 0x109   : > { %4025 = vmatprep.subr.bf16.mxu0 %v4024_v3  ;;  %4029 = vmatprep.subr.bf16.mxu1 %v4028_v4 }
 0x10a   : > { %3860 = vmatmul.mubr.msk.f32.gmra.mrb[10].mxu0 %vm214_vm0, %v542_v5  ;;  %3870 = vmatmul.mubr.msk.f32.gmra.mrb[10].mxu1 %vm214_vm0, %v542_v5 }
 0x10b   : > { %3876 = vmatprep.mubr.msk.f32.mxu0 %vm214_vm0, %v539_v60  ;;  %3886 = vmatprep.mubr.msk.f32.mxu1 %vm214_vm0, %v539_v60 }
 0x10e   : > { %3877 = vmatmul.mubr.msk.f32.vlgmr.msra.gmra.mrb[12].mxu0 %vm214_vm0, %v540_v1  ;;  %3887 = vmatmul.mubr.msk.f32.vlgmr.msra.gmra.mrb[12].mxu1 %vm214_vm0, %v540_v1 }
 0x10f   : > { %3879 = vmatprep.mubr.msk.f32.mxu0 %vm214_vm0, %v541_v2  ;;  %3889 = vmatprep.mubr.msk.f32.mxu1 %vm214_vm0, %v541_v2 }
 0x110   : > { %4027 = vmatpush3.bf16.msra.mxu0 %v4024_v3  ;;  %4031 = vmatpush3.bf16.msra.mxu1 %v4028_v4 }
 0x111   : > { %4033 = vmatprep.subr.bf16.mxu0 %v4032_v10  ;;  %4037 = vmatprep.subr.bf16.mxu1 %v4036_v11 }
 0x112   : > { %3880 = vmatmul.mubr.msk.f32.gmra.mrb[14].mxu0 %vm214_vm0, %v542_v5  ;;  %3890 = vmatmul.mubr.msk.f32.gmra.mrb[14].mxu1 %vm214_vm0, %v542_v5 }
 0x113   : > { %3896 = vmatprep.mubr.msk.f32.mxu0 %vm214_vm0, %v4197_v16  ;;  %3903 = vmatprep.mubr.msk.f32.mxu1 %vm214_vm0, %v4199_v17 }
 0x116   : > { %3897 = vmatmul.mubr.msk.f32.vlgmr.msra.gmra.mrb[16].mxu0 %vm214_vm0, %v4201_v18  ;;  %3904 = vmatmul.mubr.msk.f32.vlgmr.msra.gmra.mrb[16].mxu1 %vm214_vm0, %v4210_v20 }
 0x117   : > { %4035 = vmatpush3.bf16.msra.mxu0 %v4032_v10  ;;  %3910 = vmatprep.mubr.msk.f32.mxu0 %vm214_vm0, %v4212_v21 }
 0x118   : > { %4039 = vmatpush3.bf16.msra.mxu1 %v4036_v11  ;;  %3917 = vmatprep.mubr.msk.f32.mxu1 %vm214_vm0, %v4214_v22  ;;  %v3601_v22 = vld [vmem:[%s4745_s1 + $0x48] sm:$0xff] }
 0x11a   : > { %3911 = vmatmul.mubr.msk.f32.vlgmr.msra.gmra.mrb[18].mxu0 %vm214_vm0, %v4229_v28 }
 0x11b   : > { %3918 = vmatmul.mubr.msk.f32.vlgmr.msra.gmra.mrb[18].mxu1 %vm214_vm0, %v4231_v29  ;;  %3924 = vmatprep.mubr.msk.f32.mxu0 %vm214_vm0, %v3600_v12 }
 0x11c   : > { %3934 = vmatprep.mubr.msk.f32.mxu1 %vm214_vm0, %v3600_v12 }
 0x1e9   : > { %v3898_v13 = vpop.f32.mrb[16].mxu0  ;;  %v3905_v14 = vpop.f32.mrb[16].mxu1 }
 0x1ea   : > { %v1636_v15 = vpop.f32.mrb[17].mxu0  ;;  %v1711_v16 = vpop.f32.mrb[17].mxu1 }
 0x1eb   : > { %v4040_v17 = vpack.c.bf16 %v3898_v13, %v1636_v15  ;;  %v4044_v18 = vpack.c.bf16 %v3905_v14, %v1711_v16 }
 0x1ed   : > { %4041 = vmatprep.subr.bf16.mxu0 %v4040_v17  ;;  %4045 = vmatprep.subr.bf16.mxu1 %v4044_v18  ;;  %v3912_v19 = vpop.f32.mrb[18].mxu0 }
 0x1ee   : > { %4043 = vmatpush3.bf16.msra.mxu0 %v4040_v17  ;;  %4047 = vmatpush3.bf16.msra.mxu1 %v4044_v18  ;;  %v1786_v20 = vpop.f32.mrb[19].mxu0  ;;  %v3919_v21 = vpop.f32.mrb[18].mxu1 }
 0x1ef   : > { %v4048_v23 = vpack.c.bf16 %v3912_v19, %v1786_v20  ;;  %v1861_v24 = vpop.f32.mrb[19].mxu1 }
 0x1f0   : > { %v4052_v26 = vpack.c.bf16 %v3919_v21, %v1861_v24 }
 0x1f1   : > { %3925 = vmatmul.mubr.msk.f32.vlgmr.msra.gmra.mrb[8].mxu0 %vm214_vm0, %v3601_v22  ;;  %3935 = vmatmul.mubr.msk.f32.vlgmr.msra.gmra.mrb[8].mxu1 %vm214_vm0, %v3601_v22 }
 0x1f2   : > { %4049 = vmatprep.subr.bf16.mxu0 %v4048_v23  ;;  %3927 = vmatprep.mubr.msk.f32.mxu0 %vm214_vm0, %v3602_v25 }
 0x1f3   : > { %3937 = vmatprep.mubr.msk.f32.mxu1 %vm214_vm0, %v3602_v25  ;;  %4051 = vmatpush3.bf16.msra.mxu0 %v4048_v23 }
 0x1f4   : > { %4053 = vmatprep.subr.bf16.mxu1 %v4052_v26 }
 0x1f5   : > { %3928 = vmatmul.mubr.msk.f32.gmra.mrb[10].mxu0 %vm214_vm0, %v3603_v27  ;;  %3938 = vmatmul.mubr.msk.f32.gmra.mrb[10].mxu1 %vm214_vm0, %v3603_v27 }
 0x1f6   : > { %4055 = vmatpush3.bf16.msra.mxu1 %v4052_v26  ;;  %3944 = vmatprep.mubr.msk.f32.mxu0 %vm214_vm0, %v3600_v12 }
 0x1f7   : > { %3954 = vmatprep.mubr.msk.f32.mxu1 %vm214_vm0, %v3600_v12 }
 0x1f9   : > { %3945 = vmatmul.mubr.msk.f32.vlgmr.msra.gmra.mrb[12].mxu0 %vm214_vm0, %v3601_v22  ;;  %3955 = vmatmul.mubr.msk.f32.vlgmr.msra.gmra.mrb[12].mxu1 %vm214_vm0, %v3601_v22 }
 0x1fa   : > { %3947 = vmatprep.mubr.msk.f32.mxu0 %vm214_vm0, %v3602_v25  ;;  %3957 = vmatprep.mubr.msk.f32.mxu1 %vm214_vm0, %v3602_v25 }
 0x1fd   : > { %3948 = vmatmul.mubr.msk.f32.gmra.mrb[14].mxu0 %vm214_vm0, %v3603_v27  ;;  %3958 = vmatmul.mubr.msk.f32.gmra.mrb[14].mxu1 %vm214_vm0, %v3603_v27 }
 0x2c4   : > { %v3926_v28 = vpop.f32.mrb[8].mxu0  ;;  %v3936_v29 = vpop.f32.mrb[8].mxu1 }
 0x2c5   : > { %2245 = vst.msk [vmem:[#allocation2 + $0x8] sm:$0xff] %vm2243_vm1, %v3926_v28  ;;  %2249 = vst.msk [vmem:[#allocation2 + $0x28] sm:$0xff] %vm2243_vm1, %v3936_v29  ;;  %v1953_v30 = vpop.f32.mrb[9].mxu0  ;;  %v2038_v31 = vpop.f32.mrb[9].mxu1 }
 0x2c6   : > { %2244 = vst.msk [vmem:[#allocation2] sm:$0xff] %vm2243_vm1, %v1953_v30  ;;  %2248 = vst.msk [vmem:[#allocation2 + $0x20] sm:$0xff] %vm2243_vm1, %v2038_v31 }
 0x2c8   : > { %v3929_v32 = vpop.f32.mrb[10].mxu0  ;;  %v3939_v33 = vpop.f32.mrb[10].mxu1 }
 0x2c9   : > { %2247 = vst.msk [vmem:[#allocation2 + $0x18] sm:$0xff] %vm2243_vm1, %v3929_v32  ;;  %2251 = vst.msk [vmem:[#allocation2 + $0x38] sm:$0xff] %vm2243_vm1, %v3939_v33  ;;  %v1963_v34 = vpop.f32.mrb[11].mxu0  ;;  %v2048_v35 = vpop.f32.mrb[11].mxu1 }
 0x2ca   : > { %2246 = vst.msk [vmem:[#allocation2 + $0x10] sm:$0xff] %vm2243_vm1, %v1963_v34  ;;  %2250 = vst.msk [vmem:[#allocation2 + $0x30] sm:$0xff] %vm2243_vm1, %v2048_v35 }
 0x2cc   : > { %v3946_v36 = vpop.f32.mrb[12].mxu0  ;;  %v3956_v37 = vpop.f32.mrb[12].mxu1  ;;  %v2536_v38 = vld [vmem:[#allocation2 + $0x2d] sm:$0x1]  ;;  %v2454_v43 = vld [vmem:[#allocation2 + $0x29] sm:$0x1] }
 0x2cd   : > { %2253 = vst.msk [vmem:[#allocation2 + $0x48] sm:$0xff] %vm2243_vm1, %v3946_v36  ;;  %2257 = vst.msk [vmem:[#allocation2 + $0x68] sm:$0xff] %vm2243_vm1, %v3956_v37  ;;  %v2123_v39 = vpop.f32.mrb[13].mxu0  ;;  %v2208_v40 = vpop.f32.mrb[13].mxu1  ;;  %v2543_v41 = vrot.slane %v2536_v38, 7  ;;  %v2461_v46 = vrot.slane %v2454_v43, 7 }
 0x2ce   : > { %2252 = vst.msk [vmem:[#allocation2 + $0x40] sm:$0xff] %vm2243_vm1, %v2123_v39  ;;  %2256 = vst.msk [vmem:[#allocation2 + $0x60] sm:$0xff] %vm2243_vm1, %v2208_v40  ;;  %v2535_v42 = vld [vmem:[#allocation2 + $0xd] sm:$0x1]  ;;  %v2557_v44 = vld [vmem:[#allocation2 + $0x2e] sm:$0x1] }
 0x2cf   : > { %v2453_v45 = vld [vmem:[#allocation2 + $0x9] sm:$0x1]  ;;  %v2564_v47 = vrot.slane %v2557_v44, 7  ;;  %v2475_v48 = vld [vmem:[#allocation2 + $0x2a] sm:$0x1]  ;;  %v2544_v55 = vsel %vm2269_vm2, %v2543_v41, %v2535_v42 }
 0x2d0   : > { %v3949_v49 = vpop.f32.mrb[14].mxu0  ;;  %v3959_v50 = vpop.f32.mrb[14].mxu1  ;;  %v2556_v51 = vld [vmem:[#allocation2 + $0xe] sm:$0x1]  ;;  %v2482_v52 = vrot.slane %v2475_v48, 7  ;;  %v2462_v56 = vsel %vm2269_vm2, %v2461_v46, %v2453_v45  ;;  %v2545_v5 = vsel %vm2271_vm3, %v2543_v41, %v2544_v55 }
 0x2d1   : > { %2255 = vst.msk [vmem:[#allocation2 + $0x58] sm:$0xff] %vm2243_vm1, %v3949_v49  ;;  %2259 = vst.msk [vmem:[#allocation2 + $0x78] sm:$0xff] %vm2243_vm1, %v3959_v50  ;;  %v2133_v53 = vpop.f32.mrb[15].mxu0  ;;  %v2218_v54 = vpop.f32.mrb[15].mxu1  ;;  %v2565_v57 = vsel %vm2269_vm2, %v2564_v47, %v2556_v51  ;;  %v2474_v58 = vld [vmem:[#allocation2 + $0xa] sm:$0x1]  ;;  %v2463_v7 = vsel %vm2271_vm3, %v2461_v46, %v2462_v56 }
 0x2d2   : > { %v2578_v59 = vld [vmem:[#allocation2 + $0x2f] sm:$0x1]  ;;  %2254 = vst.msk [vmem:[#allocation2 + $0x50] sm:$0xff] %vm2243_vm1, %v2133_v53  ;;  %2258 = vst.msk [vmem:[#allocation2 + $0x70] sm:$0xff] %vm2243_vm1, %v2218_v54  ;;  %v2483_v60 = vsel %vm2269_vm2, %v2482_v52, %v2474_v58  ;;  %v2496_v63 = vld [vmem:[#allocation2 + $0x2b] sm:$0x1]  ;;  %v2566_v8 = vsel %vm2271_vm3, %v2564_v47, %v2565_v57 }
 0x2d3   : > { %v2577_v61 = vld [vmem:[#allocation2 + $0xf] sm:$0x1]  ;;  %v2585_v62 = vrot.slane %v2578_v59, 7  ;;  %v2495_v0 = vld [vmem:[#allocation2 + $0xb] sm:$0x1]  ;;  %v2503_v1 = vrot.slane %v2496_v63, 7  ;;  %v2484_v14 = vsel %vm2271_vm3, %v2482_v52, %v2483_v60 }
 0x2d4   : > { %v4401_v2 = vld [vmem:[#allocation2 + $0x22] sm:$0x1]  ;;  %v2537_v3 = vld [vmem:[#allocation2 + $0x4d] sm:$0x1]  ;;  %v2455_v6 = vld [vmem:[#allocation2 + $0x49] sm:$0x1] }
 0x2d5   : > { %v2538_v4 = vld [vmem:[#allocation2 + $0x6d] sm:$0x1]  ;;  %v2586_v9 = vsel %vm2269_vm2, %v2585_v62, %v2577_v61  ;;  %v2546_v10 = vrot.slane %v2537_v3, 6  ;;  %v2456_v12 = vld [vmem:[#allocation2 + $0x69] sm:$0x1]  ;;  %v2464_v13 = vrot.slane %v2455_v6, 6  ;;  %v2504_v19 = vsel %vm2269_vm2, %v2503_v1, %v2495_v0 }
 0x2d6   : > { %v2549_v11 = vrot.slane %v2538_v4, 5  ;;  %v2467_v15 = vrot.slane %v2456_v12, 5  ;;  %v2558_v16 = vld [vmem:[#allocation2 + $0x4e] sm:$0x1]  ;;  %v2587_v18 = vsel %vm2271_vm3, %v2585_v62, %v2586_v9  ;;  %v2316_v20 = vrot.slane %v4401_v2, 7 }
 0x2d7   : > { %v2559_v17 = vld [vmem:[#allocation2 + $0x6e] sm:$0x1]  ;;  %v2547_v21 = vsel %vm2274_vm4, %v2546_v10, %v2545_v5  ;;  %v2465_v22 = vsel %vm2274_vm4, %v2464_v13, %v2463_v7  ;;  %v2567_v23 = vrot.slane %v2558_v16, 6  ;;  %v2476_v25 = vld [vmem:[#allocation2 + $0x4a] sm:$0x1]  ;;  %v2505_v52 = vsel %vm2271_vm3, %v2503_v1, %v2504_v19 }
 0x2d8   : > { %v2570_v24 = vrot.slane %v2559_v17, 5  ;;  %v2477_v26 = vld [vmem:[#allocation2 + $0x6a] sm:$0x1]  ;;  %v2548_v27 = vsel %vm2276_vm5, %v2546_v10, %v2547_v21  ;;  %v2466_v28 = vsel %vm2276_vm5, %v2464_v13, %v2465_v22  ;;  %v2485_v29 = vrot.slane %v2476_v25, 6  ;;  %v2579_v31 = vld [vmem:[#allocation2 + $0x4f] sm:$0x1] }
 0x2d9   : > { %v2488_v30 = vrot.slane %v2477_v26, 5  ;;  %v2580_v32 = vld [vmem:[#allocation2 + $0x6f] sm:$0x1]  ;;  %v2550_v33 = vsel %vm2279_vm6, %v2549_v11, %v2548_v27  ;;  %v2468_v34 = vsel %vm2279_vm6, %v2467_v15, %v2466_v28  ;;  %v2568_v35 = vsel %vm2274_vm4, %v2567_v23, %v2566_v8  ;;  %v2497_v41 = vld [vmem:[#allocation2 + $0x4b] sm:$0x1] }
 0x2da   : > { %v2588_v36 = vrot.slane %v2579_v31, 6  ;;  %v2551_v37 = vsel %vm2281_vm7, %v2549_v11, %v2550_v33  ;;  %v2469_v38 = vsel %vm2281_vm7, %v2467_v15, %v2468_v34  ;;  %v2569_v39 = vsel %vm2276_vm5, %v2567_v23, %v2568_v35  ;;  %v2498_v42 = vld [vmem:[#allocation2 + $0x6b] sm:$0x1]  ;;  %v2310_v47 = vld [vmem:[#allocation2 + $0x42] sm:$0x1] }
 0x2db   : > { %v2486_v40 = vsel %vm2274_vm4, %v2485_v29, %v2484_v14  ;;  %2552 = vrot.lane.b32.xlu1 %v2551_v37, %s4117_s21  ;;  %2470 = vrot.lane.b32.xlu0 %v2469_v38, %s4117_s21  ;;  %v2571_v43 = vsel %vm2279_vm6, %v2570_v24, %v2569_v39  ;;  %v2591_v46 = vrot.slane %v2580_v32, 5  ;;  %v2311_v48 = vld [vmem:[#allocation2 + $0x62] sm:$0x1]  ;;  %v2287_v54 = vld [vmem:[#allocation2 + $0x21] sm:$0x1]  ;;  %v2506_v58 = vrot.slane %v2497_v41, 6 }
 0x2dc   : > { %v2487_v44 = vsel %vm2276_vm5, %v2485_v29, %v2486_v40  ;;  %v2589_v45 = vsel %vm2274_vm4, %v2588_v36, %v2587_v18  ;;  %v2572_v49 = vsel %vm2281_vm7, %v2570_v24, %v2571_v43  ;;  %v2308_v53 = vld [vmem:[#allocation2 + $0x2] sm:$0x1]  ;;  %v2288_v55 = vld [vmem:[#allocation2 + $0x41] sm:$0x1]  ;;  %v2509_v59 = vrot.slane %v2498_v42, 5 }
 0x2dd   : > { %v2489_v50 = vsel %vm2279_vm6, %v2488_v30, %v2487_v44  ;;  %v2590_v51 = vsel %vm2276_vm5, %v2588_v36, %v2589_v45  ;;  %v2289_v60 = vld [vmem:[#allocation2 + $0x61] sm:$0x1]  ;;  %v2393_v61 = vld [vmem:[#allocation2 + $0x26] sm:$0x1]  ;;  %v2317_v63 = vsel %vm2269_vm2, %v2316_v20, %v2308_v53  ;;  %v2319_v0 = vrot.slane %v2310_v47, 6 }
 0x2de   : > { %v2490_v56 = vsel %vm2281_vm7, %v2488_v30, %v2489_v50  ;;  %v2592_v57 = vsel %vm2279_vm6, %v2591_v46, %v2590_v51  ;;  %v2322_v2 = vrot.slane %v2311_v48, 5  ;;  %v2394_v3 = vld [vmem:[#allocation2 + $0x46] sm:$0x1]  ;;  %v2507_v1 = vsel %vm2274_vm4, %v2506_v58, %v2505_v52  ;;  %v2286_v5 = vld [vmem:[#allocation2 + $0x1] sm:$0x1] }
 0x2df   : > { %v2593_v62 = vsel %vm2281_vm7, %v2591_v46, %v2592_v57  ;;  %2573 = vrot.lane.b32.xlu1 %v2572_v49, %s4118_s22  ;;  %2491 = vrot.lane.b32.xlu0 %v2490_v56, %s4118_s22  ;;  %v2318_v4 = vsel %vm2271_vm3, %v2316_v20, %v2317_v63  ;;  %v2294_v6 = vrot.slane %v2287_v54, 7  ;;  %v2297_v7 = vrot.slane %v2288_v55, 6  ;;  %v2392_v11 = vld [vmem:[#allocation2 + $0x6] sm:$0x1]  ;;  %v2372_v18 = vld [vmem:[#allocation2 + $0x25] sm:$0x1] }
 0x2e0   : > { %v2508_v8 = vsel %vm2276_vm5, %v2506_v58, %v2507_v1  ;;  %v2320_v9 = vsel %vm2274_vm4, %v2319_v0, %v2318_v4  ;;  %v2300_v10 = vrot.slane %v2289_v60, 5  ;;  %v2395_v12 = vld [vmem:[#allocation2 + $0x66] sm:$0x1]  ;;  %v2400_v13 = vrot.slane %v2393_v61, 7  ;;  %v2373_v19 = vld [vmem:[#allocation2 + $0x45] sm:$0x1] }
 0x2e1   : > { %v2510_v14 = vsel %vm2279_vm6, %v2509_v59, %v2508_v8  ;;  %v2321_v15 = vsel %vm2276_vm5, %v2319_v0, %v2320_v9  ;;  %v2295_v16 = vsel %vm2269_vm2, %v2294_v6, %v2286_v5  ;;  %v2403_v17 = vrot.slane %v2394_v3, 6  ;;  %v2374_v24 = vld [vmem:[#allocation2 + $0x65] sm:$0x1]  ;;  %v2414_v25 = vld [vmem:[#allocation2 + $0x27] sm:$0x1] }
 0x2e2   : > { %v2511_v20 = vsel %vm2281_vm7, %v2509_v59, %v2510_v14  ;;  %v2323_v21 = vsel %vm2279_vm6, %v2322_v2, %v2321_v15  ;;  %v2296_v22 = vsel %vm2271_vm3, %v2294_v6, %v2295_v16  ;;  %v2401_v23 = vsel %vm2269_vm2, %v2400_v13, %v2392_v11  ;;  %v2371_v30 = vld [vmem:[#allocation2 + $0x5] sm:$0x1]  ;;  %v2415_v31 = vld [vmem:[#allocation2 + $0x47] sm:$0x1]  ;;  %v2331_v42 = vld [vmem:[#allocation2 + $0x23] sm:$0x1] }
 0x2e3   : > { %2594 = vrot.lane.b32.xlu1 %v2593_v62, %s4119_s23  ;;  %2512 = vrot.lane.b32.xlu0 %v2511_v20, %s4119_s23  ;;  %v2324_v26 = vsel %vm2281_vm7, %v2322_v2, %v2323_v21  ;;  %v2298_v27 = vsel %vm2274_vm4, %v2297_v7, %v2296_v22  ;;  %v2402_v28 = vsel %vm2271_vm3, %v2400_v13, %v2401_v23  ;;  %v2406_v29 = vrot.slane %v2395_v12, 5  ;;  %v2413_v36 = vld [vmem:[#allocation2 + $0x7] sm:$0x1]  ;;  %v2332_v43 = vld [vmem:[#allocation2 + $0x43] sm:$0x1] }
 0x2e4   : > { %v2299_v32 = vsel %vm2276_vm5, %v2297_v7, %v2298_v27  ;;  %v2404_v33 = vsel %vm2274_vm4, %v2403_v17, %v2402_v28  ;;  %v2379_v34 = vrot.slane %v2372_v18, 7  ;;  %v2382_v35 = vrot.slane %v2373_v19, 6  ;;  %v2416_v37 = vld [vmem:[#allocation2 + $0x67] sm:$0x1]  ;;  %v2333_v48 = vld [vmem:[#allocation2 + $0x63] sm:$0x1] }
 0x2e5   : > { %v2301_v38 = vsel %vm2279_vm6, %v2300_v10, %v2299_v32  ;;  %v2405_v39 = vsel %vm2276_vm5, %v2403_v17, %v2404_v33  ;;  %v2385_v40 = vrot.slane %v2374_v24, 5  ;;  %v2421_v41 = vrot.slane %v2414_v25, 7  ;;  %v2864_v49 = vld [vmem:[#allocation2 + $0x3d] sm:$0x1]  ;;  %v2330_v57 = vld [vmem:[#allocation2 + $0x3] sm:$0x1] }
 0x2e6   : > { %v2302_v44 = vsel %vm2281_vm7, %v2300_v10, %v2301_v38  ;;  %v2407_v45 = vsel %vm2279_vm6, %v2406_v29, %v2405_v39  ;;  %v2380_v46 = vsel %vm2269_vm2, %v2379_v34, %v2371_v30  ;;  %v2424_v47 = vrot.slane %v2415_v31, 6  ;;  %v2865_v54 = vld [vmem:[#allocation2 + $0x5d] sm:$0x1]  ;;  %v2782_v6 = vld [vmem:[#allocation2 + $0x39] sm:$0x1] }
 0x2e7   : > { %2325 = vrot.lane.b32.xlu1 %v2324_v26, %s4118_s22  ;;  %2303 = vrot.lane.b32.xlu0 %v2302_v44, %s4117_s21  ;;  %v2408_v50 = vsel %vm2281_vm7, %v2406_v29, %v2407_v45  ;;  %v2381_v51 = vsel %vm2271_vm3, %v2379_v34, %v2380_v46  ;;  %v2422_v52 = vsel %vm2269_vm2, %v2421_v41, %v2413_v36  ;;  %v2427_v53 = vrot.slane %v2416_v37, 5  ;;  %v2863_v63 = vld [vmem:[#allocation2 + $0x1d] sm:$0x1]  ;;  %v2783_v7 = vld [vmem:[#allocation2 + $0x59] sm:$0x1] }
 0x2e8   : > { %v2383_v55 = vsel %vm2274_vm4, %v2382_v35, %v2381_v51  ;;  %v2423_v56 = vsel %vm2271_vm3, %v2421_v41, %v2422_v52  ;;  %v2338_v58 = vrot.slane %v2331_v42, 7  ;;  %v2341_v59 = vrot.slane %v2332_v43, 6  ;;  %v2866_v0 = vld [vmem:[#allocation2 + $0x7d] sm:$0x1]  ;;  %v2784_v12 = vld [vmem:[#allocation2 + $0x79] sm:$0x1] }
 0x2e9   : > { %v2384_v60 = vsel %vm2276_vm5, %v2382_v35, %v2383_v55  ;;  %v2425_v61 = vsel %vm2274_vm4, %v2424_v47, %v2423_v56  ;;  %v2344_v62 = vrot.slane %v2333_v48, 5  ;;  %v2871_v2 = vrot.slane %v2864_v49, 7  ;;  %v2885_v13 = vld [vmem:[#allocation2 + $0x3e] sm:$0x1]  ;;  %v2781_v18 = vld [vmem:[#allocation2 + $0x19] sm:$0x1] }
 0x2ea   : > { %v2386_v3 = vsel %vm2279_vm6, %v2385_v40, %v2384_v60  ;;  %v2426_v1 = vsel %vm2276_vm5, %v2424_v47, %v2425_v61  ;;  %v2339_v4 = vsel %vm2269_vm2, %v2338_v58, %v2330_v57  ;;  %v2874_v5 = vrot.slane %v2865_v54, 6  ;;  %v2886_v19 = vld [vmem:[#allocation2 + $0x5e] sm:$0x1]  ;;  %v2803_v30 = vld [vmem:[#allocation2 + $0x3a] sm:$0x1] }
 0x2eb   : > { %2409 = vrot.lane.b32.xlu1 %v2408_v50, %s4118_s22  ;;  %v2387_v8 = vsel %vm2281_vm7, %v2385_v40, %v2386_v3  ;;  %v2428_v9 = vsel %vm2279_vm6, %v2427_v53, %v2426_v1  ;;  %v2340_v10 = vsel %vm2271_vm3, %v2338_v58, %v2339_v4  ;;  %v2872_v11 = vsel %vm2269_vm2, %v2871_v2, %v2863_v63  ;;  %v2884_v24 = vld [vmem:[#allocation2 + $0x1e] sm:$0x1]  ;;  %v2804_v31 = vld [vmem:[#allocation2 + $0x5a] sm:$0x1]  ;;  %v2700_v37 = vld [vmem:[#allocation2 + $0x35] sm:$0x1] }
 0x2ec   : > { %2388 = vrot.lane.b32.xlu0 %v2387_v8, %s4117_s21  ;;  %v2429_v14 = vsel %vm2281_vm7, %v2427_v53, %v2428_v9  ;;  %v2342_v15 = vsel %vm2274_vm4, %v2341_v59, %v2340_v10  ;;  %v2873_v16 = vsel %vm2271_vm3, %v2871_v2, %v2872_v11  ;;  %v2877_v17 = vrot.slane %v2866_v0, 5  ;;  %v2887_v25 = vld [vmem:[#allocation2 + $0x7e] sm:$0x1]  ;;  %v2805_v36 = vld [vmem:[#allocation2 + $0x7a] sm:$0x1] }
 0x2ed   : > { %v2343_v20 = vsel %vm2276_vm5, %v2341_v59, %v2342_v15  ;;  %v2875_v21 = vsel %vm2274_vm4, %v2874_v5, %v2873_v16  ;;  %v2789_v22 = vrot.slane %v2782_v6, 7  ;;  %v2792_v23 = vrot.slane %v2783_v7, 6  ;;  %v2701_v42 = vld [vmem:[#allocation2 + $0x55] sm:$0x1]  ;;  %v2802_v45 = vld [vmem:[#allocation2 + $0x1a] sm:$0x1] }
 0x2ee   : > { %v2345_v26 = vsel %vm2279_vm6, %v2344_v62, %v2343_v20  ;;  %v2876_v27 = vsel %vm2276_vm5, %v2874_v5, %v2875_v21  ;;  %v2795_v28 = vrot.slane %v2784_v12, 5  ;;  %v2892_v29 = vrot.slane %v2885_v13, 7  ;;  %v2699_v51 = vld [vmem:[#allocation2 + $0x15] sm:$0x1]  ;;  %v2618_v58 = vld [vmem:[#allocation2 + $0x31] sm:$0x1] }
 0x2ef   : > { %2430 = vrot.lane.b32.xlu1 %v2429_v14, %s4119_s23  ;;  %v2346_v32 = vsel %vm2281_vm7, %v2344_v62, %v2345_v26  ;;  %v2878_v33 = vsel %vm2279_vm6, %v2877_v17, %v2876_v27  ;;  %v2790_v34 = vsel %vm2269_vm2, %v2789_v22, %v2781_v18  ;;  %v2895_v35 = vrot.slane %v2886_v19, 6  ;;  %v2702_v52 = vld [vmem:[#allocation2 + $0x75] sm:$0x1]  ;;  %v2619_v59 = vld [vmem:[#allocation2 + $0x51] sm:$0x1] }
 0x2f0   : > { %2347 = vrot.lane.b32.xlu0 %v2346_v32, %s4119_s23  ;;  %v2879_v38 = vsel %vm2281_vm7, %v2877_v17, %v2878_v33  ;;  %v2791_v39 = vsel %vm2271_vm3, %v2789_v22, %v2790_v34  ;;  %v2893_v40 = vsel %vm2269_vm2, %v2892_v29, %v2884_v24  ;;  %v2898_v41 = vrot.slane %v2887_v25, 5  ;;  %v2620_v0 = vld [vmem:[#allocation2 + $0x71] sm:$0x1]  ;;  %v2721_v2 = vld [vmem:[#allocation2 + $0x36] sm:$0x1] }
 0x2f1   : > { %v2793_v43 = vsel %vm2274_vm4, %v2792_v23, %v2791_v39  ;;  %v2894_v44 = vsel %vm2271_vm3, %v2892_v29, %v2893_v40  ;;  %v2810_v46 = vrot.slane %v2803_v30, 7  ;;  %v2813_v47 = vrot.slane %v2804_v31, 6  ;;  %v2617_v6 = vld [vmem:[#allocation2 + $0x11] sm:$0x1]  ;;  %v2722_v7 = vld [vmem:[#allocation2 + $0x56] sm:$0x1] }
 0x2f2   : > { %v2794_v48 = vsel %vm2276_vm5, %v2792_v23, %v2793_v43  ;;  %v2896_v49 = vsel %vm2274_vm4, %v2895_v35, %v2894_v44  ;;  %v2816_v50 = vrot.slane %v2805_v36, 5  ;;  %v2707_v53 = vrot.slane %v2700_v37, 7  ;;  %v2720_v12 = vld [vmem:[#allocation2 + $0x16] sm:$0x1]  ;;  %v2639_v18 = vld [vmem:[#allocation2 + $0x32] sm:$0x1] }
 0x2f3   : > { %2880 = vrot.lane.b32.xlu1 %v2879_v38, %s4117_s21  ;;  %v2796_v54 = vsel %vm2279_vm6, %v2795_v28, %v2794_v48  ;;  %v2897_v55 = vsel %vm2276_vm5, %v2895_v35, %v2896_v49  ;;  %v2811_v56 = vsel %vm2269_vm2, %v2810_v46, %v2802_v45  ;;  %v2710_v57 = vrot.slane %v2701_v42, 6  ;;  %v2723_v13 = vld [vmem:[#allocation2 + $0x76] sm:$0x1]  ;;  %v2640_v19 = vld [vmem:[#allocation2 + $0x52] sm:$0x1] }
 0x2f4   : > { %v2797_v60 = vsel %vm2281_vm7, %v2795_v28, %v2796_v54  ;;  %v2899_v61 = vsel %vm2279_vm6, %v2898_v41, %v2897_v55  ;;  %v2812_v62 = vsel %vm2271_vm3, %v2810_v46, %v2811_v56  ;;  %v2708_v63 = vsel %vm2269_vm2, %v2707_v53, %v2699_v51  ;;  %v2641_v24 = vld [vmem:[#allocation2 + $0x72] sm:$0x1]  ;;  %v2742_v25 = vld [vmem:[#allocation2 + $0x37] sm:$0x1]  ;;  %v2660_v46 = vld [vmem:[#allocation2 + $0x33] sm:$0x1] }
 0x2f5   : > { %2798 = vrot.lane.b32.xlu0 %v2797_v60, %s4117_s21  ;;  %v2900_v3 = vsel %vm2281_vm7, %v2898_v41, %v2899_v61  ;;  %v2814_v1 = vsel %vm2274_vm4, %v2813_v47, %v2812_v62  ;;  %v2709_v4 = vsel %vm2271_vm3, %v2707_v53, %v2708_v63  ;;  %v2713_v5 = vrot.slane %v2702_v52, 5  ;;  %v2743_v30 = vld [vmem:[#allocation2 + $0x57] sm:$0x1]  ;;  %v2638_v33 = vld [vmem:[#allocation2 + $0x12] sm:$0x1] }
 0x2f6   : > { %v2815_v8 = vsel %vm2276_vm5, %v2813_v47, %v2814_v1  ;;  %v2711_v9 = vsel %vm2274_vm4, %v2710_v57, %v2709_v4  ;;  %v2625_v10 = vrot.slane %v2618_v58, 7  ;;  %v2628_v11 = vrot.slane %v2619_v59, 6  ;;  %v2741_v39 = vld [vmem:[#allocation2 + $0x17] sm:$0x1]  ;;  %v2661_v47 = vld [vmem:[#allocation2 + $0x53] sm:$0x1] }
 0x2f7   : > { %2901 = vrot.lane.b32.xlu1 %v2900_v3, %s4118_s22  ;;  %v2817_v14 = vsel %vm2279_vm6, %v2816_v50, %v2815_v8  ;;  %v2712_v15 = vsel %vm2276_vm5, %v2710_v57, %v2711_v9  ;;  %v2631_v16 = vrot.slane %v2620_v0, 5  ;;  %v2728_v17 = vrot.slane %v2721_v2, 7  ;;  %v2744_v40 = vld [vmem:[#allocation2 + $0x77] sm:$0x1]  ;;  %v2906_v52 = vld [vmem:[#allocation2 + $0x3f] sm:$0x1] }
 0x2f8   : > { %v2818_v20 = vsel %vm2281_vm7, %v2816_v50, %v2817_v14  ;;  %v2714_v21 = vsel %vm2279_vm6, %v2713_v5, %v2712_v15  ;;  %v2626_v22 = vsel %vm2269_vm2, %v2625_v10, %v2617_v6  ;;  %v2731_v23 = vrot.slane %v2722_v7, 6  ;;  %v2659_v57 = vld [vmem:[#allocation2 + $0x13] sm:$0x1]  ;;  %v2907_v58 = vld [vmem:[#allocation2 + $0x5f] sm:$0x1] }
 0x2f9   : > { %2819 = vrot.lane.b32.xlu0 %v2818_v20, %s4118_s22  ;;  %v2715_v26 = vsel %vm2281_vm7, %v2713_v5, %v2714_v21  ;;  %v2627_v27 = vsel %vm2271_vm3, %v2625_v10, %v2626_v22  ;;  %v2729_v28 = vsel %vm2269_vm2, %v2728_v17, %v2720_v12  ;;  %v2734_v29 = vrot.slane %v2723_v13, 5  ;;  %v2662_v61 = vld [vmem:[#allocation2 + $0x73] sm:$0x1]  ;;  %v2905_v0 = vld [vmem:[#allocation2 + $0x1f] sm:$0x1] }
 0x2fa   : > { %v2629_v31 = vsel %vm2274_vm4, %v2628_v11, %v2627_v27  ;;  %v2730_v32 = vsel %vm2271_vm3, %v2728_v17, %v2729_v28  ;;  %v2646_v34 = vrot.slane %v2639_v18, 7  ;;  %v2649_v35 = vrot.slane %v2640_v19, 6  ;;  %v2824_v4 = vld [vmem:[#allocation2 + $0x3b] sm:$0x1]  ;;  %v2908_v9 = vld [vmem:[#allocation2 + $0x7f] sm:$0x1] }
 0x2fb   : > { %2716 = vrot.lane.b32.xlu1 %v2715_v26, %s4117_s21  ;;  %v2630_v36 = vsel %vm2276_vm5, %v2628_v11, %v2629_v31  ;;  %v2732_v37 = vsel %vm2274_vm4, %v2731_v23, %v2730_v32  ;;  %v2652_v38 = vrot.slane %v2641_v24, 5  ;;  %v2749_v41 = vrot.slane %v2742_v25, 7  ;;  %v2825_v5 = vld [vmem:[#allocation2 + $0x5b] sm:$0x1]  ;;  %v2517_v11 = vld [vmem:[#allocation2 + $0x2c] sm:$0x1] }
 0x2fc   : > { %v2632_v42 = vsel %vm2279_vm6, %v2631_v16, %v2630_v36  ;;  %v2733_v43 = vsel %vm2276_vm5, %v2731_v23, %v2732_v37  ;;  %v2647_v44 = vsel %vm2269_vm2, %v2646_v34, %v2638_v33  ;;  %v2752_v45 = vrot.slane %v2743_v30, 6  ;;  %v2823_v19 = vld [vmem:[#allocation2 + $0x1b] sm:$0x1]  ;;  %v2516_v22 = vld [vmem:[#allocation2 + $0xc] sm:$0x1] }
 0x2fd   : > { %v2633_v48 = vsel %vm2281_vm7, %v2631_v16, %v2632_v42  ;;  %v2735_v49 = vsel %vm2279_vm6, %v2734_v29, %v2733_v43  ;;  %v2648_v50 = vsel %vm2271_vm3, %v2646_v34, %v2647_v44  ;;  %v2750_v51 = vsel %vm2269_vm2, %v2749_v41, %v2741_v39  ;;  %v2826_v16 = vld [vmem:[#allocation2 + $0x7b] sm:$0x1]  ;;  %v2519_v26 = vld [vmem:[#allocation2 + $0x6c] sm:$0x1]  ;;  %v2435_v33 = vld [vmem:[#allocation2 + $0x28] sm:$0x1] }
 0x2fe   : > { %2634 = vrot.lane.b32.xlu0 %v2633_v48, %s4117_s21  ;;  %v2736_v53 = vsel %vm2281_vm7, %v2734_v29, %v2735_v49  ;;  %v2650_v54 = vsel %vm2274_vm4, %v2649_v35, %v2648_v50  ;;  %v2751_v55 = vsel %vm2271_vm3, %v2749_v41, %v2750_v51  ;;  %v2755_v56 = vrot.slane %v2744_v40, 5  ;;  %v2518_v28 = vld [vmem:[#allocation2 + $0x4c] sm:$0x1]  ;;  %v2436_v34 = vld [vmem:[#allocation2 + $0x48] sm:$0x1] }
 0x2ff   : > { %2737 = vrot.lane.b32.xlu1 %v2736_v53, %s4118_s22  ;;  %v2651_v59 = vsel %vm2276_vm5, %v2649_v35, %v2650_v54  ;;  %v2753_v60 = vsel %vm2274_vm4, %v2752_v45, %v2751_v55  ;;  %v2667_v62 = vrot.slane %v2660_v46, 7  ;;  %v2670_v63 = vrot.slane %v2661_v47, 6  ;;  %v2437_v39 = vld [vmem:[#allocation2 + $0x68] sm:$0x1]  ;;  %v2261_v40 = vld [vmem:[#allocation2 + $0x20] sm:$0x1] }
 0x300   : > { %v2653_v2 = vsel %vm2279_vm6, %v2652_v38, %v2651_v59  ;;  %v2754_v3 = vsel %vm2276_vm5, %v2752_v45, %v2753_v60  ;;  %v2913_v1 = vrot.slane %v2906_v52, 7  ;;  %v2916_v10 = vrot.slane %v2907_v58, 6  ;;  %v2262_v45 = vld [vmem:[#allocation2 + $0x40] sm:$0x1]  ;;  %v2353_v50 = vld [vmem:[#allocation2 + $0x24] sm:$0x1] }
 0x301   : > { %v2654_v6 = vsel %vm2281_vm7, %v2652_v38, %v2653_v2  ;;  %v2756_v7 = vsel %vm2279_vm6, %v2755_v56, %v2754_v3  ;;  %v2668_v8 = vsel %vm2269_vm2, %v2667_v62, %v2659_v57  ;;  %v2673_v14 = vrot.slane %v2662_v61, 5  ;;  %v2434_v53 = vld [vmem:[#allocation2 + $0x8] sm:$0x1]  ;;  %v2260_v60 = vld [vmem:[#allocation2] sm:$0x1] }
 0x302   : > { %2655 = vrot.lane.b32.xlu0 %v2654_v6, %s4118_s22  ;;  %v2757_v12 = vsel %vm2281_vm7, %v2755_v56, %v2756_v7  ;;  %v2669_v13 = vsel %vm2271_vm3, %v2667_v62, %v2668_v8  ;;  %v2914_v15 = vsel %vm2269_vm2, %v2913_v1, %v2905_v0  ;;  %v2831_v20 = vrot.slane %v2824_v4, 7  ;;  %v2354_v56 = vld [vmem:[#allocation2 + $0x44] sm:$0x1]  ;;  %v2263_v61 = vld [vmem:[#allocation2 + $0x60] sm:$0x1] }
 0x303   : > { %2758 = vrot.lane.b32.xlu1 %v2757_v12, %s4119_s23  ;;  %v2671_v17 = vsel %vm2274_vm4, %v2670_v63, %v2669_v13  ;;  %v2915_v18 = vsel %vm2271_vm3, %v2913_v1, %v2914_v15  ;;  %v2834_v21 = vrot.slane %v2825_v5, 6  ;;  %v2919_v25 = vrot.slane %v2908_v9, 5  ;;  %v2845_v1 = vld [vmem:[#allocation2 + $0x3c] sm:$0x1]  ;;  %v2352_v7 = vld [vmem:[#allocation2 + $0x4] sm:$0x1] }
 0x304   : > { %v2672_v23 = vsel %vm2276_vm5, %v2670_v63, %v2671_v17  ;;  %v2917_v24 = vsel %vm2274_vm4, %v2916_v10, %v2915_v18  ;;  %v2524_v27 = vrot.slane %v2517_v11, 7  ;;  %v2832_v31 = vsel %vm2269_vm2, %v2831_v20, %v2823_v19  ;;  %v2355_v8 = vld [vmem:[#allocation2 + $0x64] sm:$0x1]  ;;  %v2846_v15 = vld [vmem:[#allocation2 + $0x5c] sm:$0x1] }
 0x305   : > { %v2674_v29 = vsel %vm2279_vm6, %v2673_v14, %v2672_v23  ;;  %v2918_v30 = vsel %vm2276_vm5, %v2916_v10, %v2917_v24  ;;  %v2837_v32 = vrot.slane %v2826_v16, 5  ;;  %v2833_v37 = vsel %vm2271_vm3, %v2831_v20, %v2832_v31  ;;  %v2847_v19 = vld [vmem:[#allocation2 + $0x7c] sm:$0x1] }
 0x306   : > { %v2675_v35 = vsel %vm2281_vm7, %v2673_v14, %v2674_v29  ;;  %v2920_v36 = vsel %vm2279_vm6, %v2919_v25, %v2918_v30  ;;  %v2525_v38 = vsel %vm2269_vm2, %v2524_v27, %v2516_v22  ;;  %v2835_v42 = vsel %vm2274_vm4, %v2834_v21, %v2833_v37  ;;  %v2844_v14 = vld [vmem:[#allocation2 + $0x1c] sm:$0x1] }
 0x307   : > { %2676 = vrot.lane.b32.xlu0 %v2675_v35, %s4119_s23  ;;  %v2921_v41 = vsel %vm2281_vm7, %v2919_v25, %v2920_v36  ;;  %v2530_v43 = vrot.slane %v2519_v26, 5  ;;  %v2527_v44 = vrot.slane %v2518_v28, 6  ;;  %v2836_v46 = vsel %vm2276_vm5, %v2834_v21, %v2835_v42  ;;  %v2763_v21 = vld [vmem:[#allocation2 + $0x38] sm:$0x1] }
 0x308   : > { %2922 = vrot.lane.b32.xlu1 %v2921_v41, %s4119_s23  ;;  %v2526_v47 = vsel %vm2271_vm3, %v2524_v27, %v2525_v38  ;;  %v2442_v48 = vrot.slane %v2435_v33, 7  ;;  %v2445_v49 = vrot.slane %v2436_v34, 6  ;;  %v2838_v51 = vsel %vm2279_vm6, %v2837_v32, %v2836_v46  ;;  %v2764_v26 = vld [vmem:[#allocation2 + $0x58] sm:$0x1]  ;;  %v2681_v27 = vld [vmem:[#allocation2 + $0x34] sm:$0x1] }
 0x309   : > { %v2528_v52 = vsel %vm2274_vm4, %v2527_v44, %v2526_v47  ;;  %v2448_v54 = vrot.slane %v2437_v39, 5  ;;  %v2268_v55 = vrot.slane %v2261_v40, 7  ;;  %v2839_v57 = vsel %vm2281_vm7, %v2837_v32, %v2838_v51  ;;  %v2765_v32 = vld [vmem:[#allocation2 + $0x78] sm:$0x1]  ;;  %v2682_v33 = vld [vmem:[#allocation2 + $0x54] sm:$0x1] }
 0x30a   : > { %v2529_v58 = vsel %vm2276_vm5, %v2527_v44, %v2528_v52  ;;  %v2443_v59 = vsel %vm2269_vm2, %v2442_v48, %v2434_v53  ;;  %v2273_v62 = vrot.slane %v2262_v45, 6  ;;  %v2360_v3 = vrot.slane %v2353_v50, 7  ;;  %v2599_v38 = vld [vmem:[#allocation2 + $0x30] sm:$0x1]  ;;  %v2762_v41 = vld [vmem:[#allocation2 + $0x18] sm:$0x1] }
 0x30b   : > { %2840 = vrot.lane.b32.xlu0 %v2839_v57, %s4119_s23  ;;  %v2531_v63 = vsel %vm2279_vm6, %v2530_v43, %v2529_v58  ;;  %v2444_v0 = vsel %vm2271_vm3, %v2442_v48, %v2443_v59  ;;  %v2270_v2 = vsel %vm2269_vm2, %v2268_v55, %v2260_v60  ;;  %v2363_v9 = vrot.slane %v2354_v56, 6  ;;  %v2680_v48 = vld [vmem:[#allocation2 + $0x14] sm:$0x1]  ;;  %v2600_v50 = vld [vmem:[#allocation2 + $0x50] sm:$0x1] }
 0x30c   : > { %v2532_v4 = vsel %vm2281_vm7, %v2530_v43, %v2531_v63  ;;  %v2446_v5 = vsel %vm2274_vm4, %v2445_v49, %v2444_v0  ;;  %v2272_v6 = vsel %vm2271_vm3, %v2268_v55, %v2270_v2  ;;  %v2278_v11 = vrot.slane %v2263_v61, 5  ;;  %v2683_v43 = vld [vmem:[#allocation2 + $0x74] sm:$0x1]  ;;  %v2598_v59 = vld [vmem:[#allocation2 + $0x10] sm:$0x1] }
 0x30d   : > { %2534 = vst.msk [vmem:[#allocation3 + $0xc] sm:$0xf] %vm2284_vm8, %v2532_v4  ;;  %v2447_v10 = vsel %vm2276_vm5, %v2445_v49, %v2446_v5  ;;  %v2275_v12 = vsel %vm2274_vm4, %v2273_v62, %v2272_v6  ;;  %v2361_v13 = vsel %vm2269_vm2, %v2360_v3, %v2352_v7  ;;  %v2852_v20 = vrot.slane %v2845_v1, 7  ;;  %v2601_v60 = vld [vmem:[#allocation2 + $0x70] sm:$0x1] }
 0x30e   : > { %v2449_v16 = vsel %vm2279_vm6, %v2448_v54, %v2447_v10  ;;  %v2277_v17 = vsel %vm2276_vm5, %v2273_v62, %v2275_v12  ;;  %v2362_v18 = vsel %vm2271_vm3, %v2360_v3, %v2361_v13  ;;  %v2366_v25 = vrot.slane %v2355_v8, 5 }
 0x30f   : > { %v2450_v22 = vsel %vm2281_vm7, %v2448_v54, %v2449_v16  ;;  %v2280_v23 = vsel %vm2279_vm6, %v2278_v11, %v2277_v17  ;;  %v2364_v24 = vsel %vm2274_vm4, %v2363_v9, %v2362_v18  ;;  %v2853_v30 = vsel %vm2269_vm2, %v2852_v20, %v2844_v14 }
 0x310   : > { %2452 = vst.msk [vmem:[#allocation3 + $0x8] sm:$0xf] %vm2284_vm8, %v2450_v22  ;;  %v2282_v28 = vsel %vm2281_vm7, %v2278_v11, %v2280_v23  ;;  %v2365_v29 = vsel %vm2276_vm5, %v2363_v9, %v2364_v24  ;;  %v2855_v31 = vrot.slane %v2846_v15, 6  ;;  %v2854_v35 = vsel %vm2271_vm3, %v2852_v20, %v2853_v30 }
 0x311   : > { %2285 = vst.msk [vmem:[#allocation3] sm:$0xf] %vm2284_vm8, %v2282_v28  ;;  %v2367_v34 = vsel %vm2279_vm6, %v2366_v25, %v2365_v29  ;;  %v2858_v36 = vrot.slane %v2847_v19, 5  ;;  %v2770_v37 = vrot.slane %v2763_v21, 7  ;;  %v2773_v42 = vrot.slane %v2764_v26, 6 }
 0x312   : > { %v2368_v39 = vsel %vm2281_vm7, %v2366_v25, %v2367_v34  ;;  %v2856_v40 = vsel %vm2274_vm4, %v2855_v31, %v2854_v35  ;;  %v2688_v44 = vrot.slane %v2681_v27, 7  ;;  %v2776_v47 = vrot.slane %v2765_v32, 5 }
 0x313   : > { %2370 = vst.msk [vmem:[#allocation3 + $0x4] sm:$0xf] %vm2284_vm8, %v2368_v39  ;;  %v2857_v45 = vsel %vm2276_vm5, %v2855_v31, %v2856_v40  ;;  %v2771_v46 = vsel %vm2269_vm2, %v2770_v37, %v2762_v41  ;;  %v2691_v49 = vrot.slane %v2682_v33, 6  ;;  %v2606_v54 = vrot.slane %v2599_v38, 7 }
 0x314   : > { %v2859_v51 = vsel %vm2279_vm6, %v2858_v36, %v2857_v45  ;;  %v2772_v52 = vsel %vm2271_vm3, %v2770_v37, %v2771_v46  ;;  %v2689_v53 = vsel %vm2269_vm2, %v2688_v44, %v2680_v48  ;;  %v2694_v58 = vrot.slane %v2683_v43, 5 }
 0x315   : > { %v2860_v55 = vsel %vm2281_vm7, %v2858_v36, %v2859_v51  ;;  %v2774_v56 = vsel %vm2274_vm4, %v2773_v42, %v2772_v52  ;;  %v2690_v57 = vsel %vm2271_vm3, %v2688_v44, %v2689_v53  ;;  %v2607_v63 = vsel %vm2269_vm2, %v2606_v54, %v2598_v59 }
 0x316   : > { %2862 = vst.msk [vmem:[#allocation3 + $0x1c] sm:$0xf] %vm2284_vm8, %v2860_v55  ;;  %v2775_v61 = vsel %vm2276_vm5, %v2773_v42, %v2774_v56  ;;  %v2692_v62 = vsel %vm2274_vm4, %v2691_v49, %v2690_v57  ;;  %v2609_v0 = vrot.slane %v2600_v50, 6  ;;  %v2608_v1 = vsel %vm2271_vm3, %v2606_v54, %v2607_v63 }
 0x317   : > { %v2777_v2 = vsel %vm2279_vm6, %v2776_v47, %v2775_v61  ;;  %v2693_v3 = vsel %vm2276_vm5, %v2691_v49, %v2692_v62  ;;  %v2612_v6 = vrot.slane %v2601_v60, 5  ;;  %vm3047_vm1 = vcmask 31744  }
 0x318   : > { %v2778_v4 = vsel %vm2281_vm7, %v2776_v47, %v2777_v2  ;;  %v2695_v5 = vsel %vm2279_vm6, %v2694_v58, %v2693_v3  ;;  %v2610_v7 = vsel %vm2274_vm4, %v2609_v0, %v2608_v1 }
 0x319   : > { %2780 = vst.msk [vmem:[#allocation3 + $0x18] sm:$0xf] %vm2284_vm8, %v2778_v4  ;;  %v2696_v8 = vsel %vm2281_vm7, %v2694_v58, %v2695_v5  ;;  %v2611_v9 = vsel %vm2276_vm5, %v2609_v0, %v2610_v7 }
 0x31a   : > { %2698 = vst.msk [vmem:[#allocation3 + $0x14] sm:$0xf] %vm2284_vm8, %v2696_v8  ;;  %v2613_v10 = vsel %vm2279_vm6, %v2612_v6, %v2611_v9 }
 0x31b   : > { %v2614_v11 = vsel %vm2281_vm7, %v2612_v6, %v2613_v10 }
 0x31c   : > { %2616 = vst.msk [vmem:[#allocation3 + $0x10] sm:$0xf] %vm2284_vm8, %v2614_v11 }
 0x34d   : > { %v2553_v12 = vpop.permute.xlu1 %2552  ;;  %v2471_v13 = vpop.permute.xlu0 %2470 }
 0x34e   : > { %2555 = vst.msk [vmem:[#allocation3 + $0xc] sm:$0xf] %vm2306_vm9, %v2553_v12  ;;  %2473 = vst.msk [vmem:[#allocation3 + $0x8] sm:$0xf] %vm2306_vm9, %v2471_v13 }
 0x351   : > { %v2574_v14 = vpop.permute.xlu1 %2573  ;;  %v2492_v15 = vpop.permute.xlu0 %2491 }
 0x352   : > { %2576 = vst.msk [vmem:[#allocation3 + $0xc] sm:$0xf] %vm2328_vm10, %v2574_v14  ;;  %2494 = vst.msk [vmem:[#allocation3 + $0x8] sm:$0xf] %vm2328_vm10, %v2492_v15 }
 0x355   : > { %v2595_v16 = vpop.permute.xlu1 %2594  ;;  %v2513_v17 = vpop.permute.xlu0 %2512 }
 0x356   : > { %2597 = vst.msk [vmem:[#allocation3 + $0xc] sm:$0xf] %vm2350_vm11, %v2595_v16  ;;  %2515 = vst.msk [vmem:[#allocation3 + $0x8] sm:$0xf] %vm2350_vm11, %v2513_v17 }
 0x359   : > { %v2326_v18 = vpop.permute.xlu1 %2325  ;;  %v2304_v19 = vpop.permute.xlu0 %2303 }
 0x35a   : > { %2307 = vst.msk [vmem:[#allocation3] sm:$0xf] %vm2306_vm9, %v2304_v19 }
 0x35b   : > { %2329 = vst.msk [vmem:[#allocation3] sm:$0xf] %vm2328_vm10, %v2326_v18  ;;  %v4120_v18 = vmov 0.0  }
 0x35c   : > { %3131 = vmatprep.mubr.f32.mxu0 %v4120_v18  ;;  %3202 = vmatprep.mubr.f32.mxu1 %v4120_v18 }
 0x35d   : > { %v2410_v20 = vpop.permute.xlu1 %2409  ;;  %v4652_v38 = vld [vmem:[#allocation3 + $0x8] sm:$0xff] }
 0x35e   : > { %v2389_v21 = vpop.permute.xlu0 %2388  ;;  %v2961_v44 = vmul.f32 %v4652_v38, %v4652_v38  ;;  %v2935_v47 = vcombine.high %v4652_v38, %v4652_v38  ;;  %v2946_v48 = vsel %vm2942_vm12, %v4652_v38, 0.0 }
 0x35f   : > { %2391 = vst.msk [vmem:[#allocation3 + $0x4] sm:$0xf] %vm2306_vm9, %v2389_v21 }
 0x360   : > { %2412 = vst.msk [vmem:[#allocation3 + $0x4] sm:$0xf] %vm2328_vm10, %v2410_v20  ;;  %v2969_v51 = vcombine.high %v2961_v44, %v2961_v44  ;;  %v2979_v52 = vsel %vm2942_vm12, %v2961_v44, 0.0  ;;  %v2948_v54 = vsel %vm2942_vm12, %v2935_v47, 0.0 }
 0x361   : > { %v2431_v22 = vpop.permute.xlu1 %2430 }
 0x362   : > { %2433 = vst.msk [vmem:[#allocation3 + $0x4] sm:$0xf] %vm2350_vm11, %v2431_v22  ;;  %v2348_v23 = vpop.permute.xlu0 %2347  ;;  %v2981_v60 = vsel %vm2942_vm12, %v2969_v51, 0.0 }
 0x363   : > { %2351 = vst.msk [vmem:[#allocation3] sm:$0xf] %vm2350_vm11, %v2348_v23 }
 0x365   : > { %v2881_v24 = vpop.permute.xlu1 %2880 }
 0x366   : > { %2883 = vst.msk [vmem:[#allocation3 + $0x1c] sm:$0xf] %vm2306_vm9, %v2881_v24  ;;  %v4121_v24 = vmov 839922192  }
 0x367   : > { %v2799_v25 = vpop.permute.xlu0 %2798 }
 0x368   : > { %2801 = vst.msk [vmem:[#allocation3 + $0x18] sm:$0xf] %vm2306_vm9, %v2799_v25  ;;  %v3000_v25 = vunpack.c.l.s4 %v4121_v24 }
 0x369   : > { %v2902_v26 = vpop.permute.xlu1 %2901 }
 0x36a   : > { %2904 = vst.msk [vmem:[#allocation3 + $0x1c] sm:$0xf] %vm2328_vm10, %v2902_v26  ;;  %v4640_v29 = vld [vmem:[#allocation3] sm:$0xff]  ;;  %v3002_v26 = vlaneseq }
 0x36b   : > { %v2820_v27 = vpop.permute.xlu0 %2819  ;;  %v2960_v31 = vmul.f32 %v4640_v29, %v4640_v29  ;;  %v2934_v33 = vcombine.high %v4640_v29, %v4640_v29  ;;  %v2943_v39 = vsel %vm2942_vm12, %v4640_v29, 0.0 }
 0x36c   : > { %2822 = vst.msk [vmem:[#allocation3 + $0x18] sm:$0xf] %vm2328_vm10, %v2820_v27 }
 0x36d   : > { %v2717_v28 = vpop.permute.xlu1 %2716  ;;  %v2968_v35 = vcombine.high %v2960_v31, %v2960_v31  ;;  %v2944_v37 = vsel %vm2942_vm12, %v2934_v33, 0.0  ;;  %v2976_v45 = vsel %vm2942_vm12, %v2960_v31, 0.0  ;;  %v3003_v31 = vshrl.u32 %v3002_v26, 7 }
 0x36e   : > { %2719 = vst.msk [vmem:[#allocation3 + $0x14] sm:$0xf] %vm2306_vm9, %v2717_v28  ;;  %v2945_v42 = vadd.f32 %v2944_v37, %v2943_v39 }
 0x36f   : > { %v2977_v40 = vsel %vm2942_vm12, %v2968_v35, 0.0 }
 0x370   : > { %v2635_v30 = vpop.permute.xlu0 %2634  ;;  %v2978_v46 = vadd.f32 %v2977_v40, %v2976_v45  ;;  %v2947_v50 = vadd.f32 %v2946_v48, %v2945_v42 }
 0x371   : > { %2637 = vst.msk [vmem:[#allocation3 + $0x10] sm:$0xf] %vm2306_vm9, %v2635_v30  ;;  %v2738_v32 = vpop.permute.xlu1 %2737  ;;  %v3001_v30 = vunpack.c.0.s8 %v3000_v25 }
 0x372   : > { %2740 = vst.msk [vmem:[#allocation3 + $0x14] sm:$0xf] %vm2328_vm10, %v2738_v32  ;;  %v2980_v53 = vadd.f32 %v2979_v52, %v2978_v46  ;;  %v2949_v56 = vadd.f32 %v2948_v54, %v2947_v50  ;;  %v3038_v54 = vld [vmem:[%s4747_s3] sm:$0xf] }
 0x373   : > { %v3004_v33 = vsub.s32 %v3001_v30, %v3003_v31 }
 0x374   : > { %v2656_v34 = vpop.permute.xlu0 %2655  ;;  %v2982_v62 = vadd.f32 %v2981_v60, %v2980_v53 }
 0x375   : > { %2658 = vst.msk [vmem:[#allocation3 + $0x10] sm:$0xf] %vm2328_vm10, %v2656_v34  ;;  %v2759_v36 = vpop.permute.xlu1 %2758 }
 0x376   : > { %2761 = vst.msk [vmem:[#allocation3 + $0x14] sm:$0xf] %vm2350_vm11, %v2759_v36 }
 0x379   : > { %v2677_v41 = vpop.permute.xlu0 %2676 }
 0x37a   : > { %2679 = vst.msk [vmem:[#allocation3 + $0x10] sm:$0xf] %vm2350_vm11, %v2677_v41  ;;  %v2923_v43 = vpop.permute.xlu1 %2922 }
 0x37b   : > { %2925 = vst.msk [vmem:[#allocation3 + $0x1c] sm:$0xf] %vm2350_vm11, %v2923_v43 }
 0x37d   : > { %v2841_v49 = vpop.permute.xlu0 %2840 }
 0x37e   : > { %2843 = vst.msk [vmem:[#allocation3 + $0x18] sm:$0xf] %vm2350_vm11, %v2841_v49 }
 0x381   : > { %v2928_v55 = vld [vmem:[#allocation3 + $0x10] sm:$0xff] }
 0x382   : > { %v2936_v57 = vcombine.high %v2928_v55, %v2928_v55  ;;  %v2950_v58 = vsel %vm2942_vm12, %v2928_v55, 0.0  ;;  %v2962_v59 = vmul.f32 %v2928_v55, %v2928_v55 }
 0x383   : > { %v2951_v61 = vadd.f32 %v2950_v58, %v2949_v56 }
 0x384   : > { %v2952_v63 = vsel %vm2942_vm12, %v2936_v57, 0.0  ;;  %v2970_v0 = vcombine.high %v2962_v59, %v2962_v59  ;;  %v2983_v2 = vsel %vm2942_vm12, %v2962_v59, 0.0 }
 0x385   : > { %v2929_v3 = vld [vmem:[#allocation3 + $0x18] sm:$0xff]  ;;  %v2953_v1 = vadd.f32 %v2952_v63, %v2951_v61  ;;  %v2984_v4 = vadd.f32 %v2983_v2, %v2982_v62 }
 0x386   : > { %v2937_v5 = vcombine.high %v2929_v3, %v2929_v3  ;;  %v2954_v6 = vsel %vm2942_vm12, %v2929_v3, 0.0  ;;  %v2963_v7 = vmul.f32 %v2929_v3, %v2929_v3  ;;  %v2985_v8 = vsel %vm2942_vm12, %v2970_v0, 0.0 }
 0x387   : > { %v2955_v9 = vadd.f32 %v2954_v6, %v2953_v1  ;;  %v2986_v10 = vadd.f32 %v2985_v8, %v2984_v4 }
 0x388   : > { %v2956_v11 = vsel %vm2942_vm12, %v2937_v5, 0.0  ;;  %v2971_v12 = vcombine.high %v2963_v7, %v2963_v7  ;;  %v2987_v13 = vsel %vm2942_vm12, %v2963_v7, 0.0 }
 0x389   : > { %v2957_v14 = vadd.f32 %v2956_v11, %v2955_v9  ;;  %v2988_v15 = vadd.f32 %v2987_v13, %v2986_v10 }
 0x38a   : > { %v2989_v16 = vsel %vm2942_vm12, %v2971_v12, 0.0 }
 0x38b   : > { %2958 = vadd.xlane.f32.xlu0 %v2957_v14  ;;  %v2990_v17 = vadd.f32 %v2989_v16, %v2988_v15 }
 0x38d   : > { %2991 = vadd.xlane.f32.xlu1 %v2990_v17 }
 0x418   : > { %v2959_v19 = vpop.xlane.xlu0 %2958 }
 0x419   : > { %v2993_v20 = vmul.f32 0.0009765625, %v2959_v19 }
 0x41a   : > { %v2992_v21 = vpop.xlane.xlu1 %2991 }
 0x41b   : > { %v2995_v22 = vmul.f32 %v2993_v20, %v2993_v20  ;;  %v2994_v23 = vmul.f32 0.0009765625, %v2992_v21  ;;  %v3005_v34 = vrot.slane %v2993_v20, %v3004_v33 }
 0x41d   : > { %v2996_v27 = vsub.f32 %v2994_v23, %v2995_v22  ;;  %v3007_v36 = vsub.f32 %v4640_v29, %v3005_v34  ;;  %v3008_v37 = vsub.f32 %v4652_v38, %v3005_v34  ;;  %v3009_v39 = vsub.f32 %v2928_v55, %v3005_v34 }
 0x41e   : > { %v3010_v40 = vsub.f32 %v2929_v3, %v3005_v34 }
 0x41f   : > { %v2997_v28 = vmax.f32 %v2996_v27, 0.0 }
 0x421   : > { %v3011_v32 = vadd.f32 1e-05, %v2997_v28 }
 0x423   : > { %4105 = vrsqrt.f32 %v3011_v32 }
 0x42d   : > { %v4106_v35 = vpop.eup %4105 }
 0x42e   : > { %v3020_v41 = vrot.slane %v4106_v35, %v3004_v33 }
 0x430   : > { %v3022_v42 = vmul.f32 %v3020_v41, %v3007_v36  ;;  %v3023_v43 = vmul.f32 %v3020_v41, %v3008_v37  ;;  %v3024_v44 = vmul.f32 %v3020_v41, %v3009_v39  ;;  %v3025_v45 = vmul.f32 %v3020_v41, %v3010_v40 }
 0x432   : > { %vm3026_vm13 = vcmp.ge.f32.partialorder %v3022_v42, 0.0  ;;  %v3030_v46 = vmul.f32 0.2, %v3022_v42  ;;  %vm3027_vm14 = vcmp.ge.f32.partialorder %v3023_v43, 0.0  ;;  %v3031_v47 = vmul.f32 0.2, %v3023_v43 }
 0x433   : > { %vm3028_vm15 = vcmp.ge.f32.partialorder %v3024_v44, 0.0  ;;  %v3032_v48 = vmul.f32 0.2, %v3024_v44  ;;  %vm3029_vm0 = vcmp.ge.f32.partialorder %v3025_v45, 0.0  ;;  %v3033_v49 = vmul.f32 0.2, %v3025_v45 }
 0x434   : > { %v3034_v50 = vsel %vm3026_vm13, %v3022_v42, %v3030_v46  ;;  %v3035_v51 = vsel %vm3027_vm14, %v3023_v43, %v3031_v47 }
 0x435   : > { %v3043_v29 = vcombine.high %v3034_v50, %v3034_v50  ;;  %v3044_v52 = vcombine.high %v3035_v51, %v3035_v51  ;;  %v3036_v38 = vsel %vm3028_vm15, %v3024_v44, %v3032_v48  ;;  %v3037_v53 = vsel %vm3029_vm0, %v3025_v45, %v3033_v49 }
 0x436   : > { %v3045_v55 = vcombine.high %v3036_v38, %v3036_v38  ;;  %v3046_v56 = vcombine.high %v3037_v53, %v3037_v53 }
 0x437   : > { %3620 = vmatprep.subr.msk.mxu0 %vm2942_vm12, %v3043_v29  ;;  %3623 = vmatprep.subr.msk.mxu1 %vm2942_vm12, %v3044_v52 }
 0x438   : > { %3621 = vmatpush1.msk.msra.mxu0 %vm2942_vm12, %v3034_v50  ;;  %3624 = vmatpush1.msk.msra.mxu1 %vm2942_vm12, %v3035_v51 }
 0x439   : > { %3622 = vmatmul.mubr.msk.f32.vlgmr.msra.gmra.mrb[20].mxu0 %vm3047_vm1, %v3038_v54  ;;  %3626 = vmatprep.subr.msk.mxu0 %vm2942_vm12, %v3045_v55 }
 0x43a   : > { %3629 = vmatprep.subr.msk.mxu1 %vm2942_vm12, %v3046_v56  ;;  %3625 = vmatmul.mubr.msk.f32.vlgmr.msra.gmra.mrb[20].mxu1 %vm3047_vm1, %v3038_v54 }
 0x43b   : > { %3627 = vmatpush1.msk.msra.mxu0 %vm2942_vm12, %v3036_v38  ;;  %3630 = vmatpush1.msk.msra.mxu1 %vm2942_vm12, %v3037_v53 }
 0x43c   : > { %3273 = vmatprep.mubr.f32.mxu0 %v4120_v18  ;;  %3344 = vmatprep.mubr.f32.mxu1 %v4120_v18 }
 0x43d   : > { %3628 = vmatmul.mubr.msk.f32.vlgmr.msra.gmra.mrb[22].mxu0 %vm3047_vm1, %v3038_v54 }
 0x43e   : > { %3631 = vmatmul.mubr.msk.f32.vlgmr.msra.gmra.mrb[22].mxu1 %vm3047_vm1, %v3038_v54 }
 0x50c   : > { %v4695_v57 = vpop.f32.mrb[20].mxu0 }
 0x50d   : > { %v3351_v58 = vsel %vm2942_vm12, %v4695_v57, 0.0  ;;  %v3368_v59 = vmul.f32 %v4695_v57, %v4695_v57  ;;  %v4701_v60 = vpop.f32.mrb[21].mxu0  ;;  %v4703_v61 = vpop.f32.mrb[20].mxu1 }
 0x50e   : > { %v3352_v62 = vsel %vm2942_vm12, %v4701_v60, 0.0  ;;  %v3369_v63 = vmul.f32 %v4701_v60, %v4701_v60  ;;  %v3354_v0 = vsel %vm2942_vm12, %v4703_v61, 0.0  ;;  %v3370_v2 = vmul.f32 %v4703_v61, %v4703_v61  ;;  %v3206_v3 = vpop.f32.mrb[21].mxu1 }
 0x50f   : > { %v3376_v1 = vsel %vm2942_vm12, %v3368_v59, 0.0  ;;  %v3353_v4 = vadd.f32 %v3352_v62, %v3351_v58  ;;  %v3371_v7 = vmul.f32 %v3206_v3, %v3206_v3  ;;  %v3356_v13 = vsel %vm2942_vm12, %v3206_v3, 0.0 }
 0x510   : > { %v3377_v5 = vsel %vm2942_vm12, %v3369_v63, 0.0  ;;  %v3379_v6 = vsel %vm2942_vm12, %v3370_v2, 0.0  ;;  %v3275_v8 = vpop.f32.mrb[22].mxu0 }
 0x511   : > { %v3378_v9 = vadd.f32 %v3377_v5, %v3376_v1  ;;  %v3355_v10 = vadd.f32 %v3354_v0, %v3353_v4  ;;  %v3277_v11 = vpop.f32.mrb[23].mxu0  ;;  %v3346_v12 = vpop.f32.mrb[22].mxu1  ;;  %v3358_v14 = vsel %vm2942_vm12, %v3275_v8, 0.0  ;;  %v3372_v15 = vmul.f32 %v3275_v8, %v3275_v8 }
 0x512   : > { %v3348_v16 = vpop.f32.mrb[23].mxu1  ;;  %v3381_v19 = vsel %vm2942_vm12, %v3371_v7, 0.0  ;;  %v3373_v21 = vmul.f32 %v3277_v11, %v3277_v11  ;;  %v3374_v22 = vmul.f32 %v3346_v12, %v3346_v12  ;;  %v3360_v25 = vsel %vm2942_vm12, %v3277_v11, 0.0 }
 0x513   : > { %v3380_v17 = vadd.f32 %v3379_v6, %v3378_v9  ;;  %v3357_v18 = vadd.f32 %v3356_v13, %v3355_v10  ;;  %v3383_v20 = vsel %vm2942_vm12, %v3372_v15, 0.0  ;;  %v3362_v26 = vsel %vm2942_vm12, %v3346_v12, 0.0 }
 0x514   : > { %v3385_v30 = vsel %vm2942_vm12, %v3373_v21, 0.0  ;;  %v3375_v31 = vmul.f32 %v3348_v16, %v3348_v16  ;;  %v3387_v32 = vsel %vm2942_vm12, %v3374_v22, 0.0  ;;  %v3364_v35 = vsel %vm2942_vm12, %v3348_v16, 0.0 }
 0x515   : > { %v3382_v23 = vadd.f32 %v3381_v19, %v3380_v17  ;;  %v3359_v24 = vadd.f32 %v3358_v14, %v3357_v18 }
 0x516   : > { %v3389_v39 = vsel %vm2942_vm12, %v3375_v31, 0.0 }
 0x517   : > { %v3384_v27 = vadd.f32 %v3383_v20, %v3382_v23  ;;  %v3361_v28 = vadd.f32 %v3360_v25, %v3359_v24 }
 0x519   : > { %v3386_v33 = vadd.f32 %v3385_v30, %v3384_v27  ;;  %v3363_v34 = vadd.f32 %v3362_v26, %v3361_v28 }
 0x51b   : > { %v3365_v36 = vadd.f32 %v3364_v35, %v3363_v34  ;;  %v3388_v37 = vadd.f32 %v3387_v32, %v3386_v33 }
 0x51d   : > { %3366 = vadd.xlane.f32.xlu0 %v3365_v36  ;;  %v3390_v40 = vadd.f32 %v3389_v39, %v3388_v37 }
 0x521   : > { %3391 = vadd.xlane.f32.xlu0 %v3390_v40 }
 0x5aa   : > { %v3367_v41 = vpop.xlane.xlu0 %3366 }
 0x5ab   : > { %v3393_v42 = vmul.f32 0.0009765625, %v3367_v41 }
 0x5ad   : > { %v3395_v44 = vmul.f32 %v3393_v42, %v3393_v42  ;;  %v3398_v49 = vsub.f32 %v4695_v57, %v3393_v42  ;;  %v3399_v50 = vsub.f32 %v4701_v60, %v3393_v42  ;;  %v3400_v51 = vsub.f32 %v4703_v61, %v3393_v42 }
 0x5ae   : > { %v3392_v43 = vpop.xlane.xlu0 %3391  ;;  %v3401_v29 = vsub.f32 %v3206_v3, %v3393_v42  ;;  %v3402_v38 = vsub.f32 %v3275_v8, %v3393_v42  ;;  %v3403_v53 = vsub.f32 %v3277_v11, %v3393_v42  ;;  %v3404_v54 = vsub.f32 %v3346_v12, %v3393_v42 }
 0x5af   : > { %v3394_v45 = vmul.f32 0.0009765625, %v3392_v43  ;;  %v3405_v55 = vsub.f32 %v3348_v16, %v3393_v42 }
 0x5b1   : > { %v3396_v46 = vsub.f32 %v3394_v45, %v3395_v44 }
 0x5b3   : > { %v3397_v47 = vmax.f32 %v3396_v46, 0.0 }
 0x5b5   : > { %v3406_v48 = vadd.f32 1e-05, %v3397_v47 }
 0x5b7   : > { %4107 = vrsqrt.f32 %v3406_v48 }
 0x5c1   : > { %v4108_v52 = vpop.eup %4107 }
 0x5c2   : > { %v3408_v56 = vmul.f32 %v4108_v52, %v3398_v49  ;;  %v3409_v58 = vmul.f32 %v4108_v52, %v3399_v50  ;;  %v3410_v59 = vmul.f32 %v4108_v52, %v3400_v51  ;;  %v3411_v62 = vmul.f32 %v4108_v52, %v3401_v29 }
 0x5c3   : > { %v3412_v63 = vmul.f32 %v4108_v52, %v3402_v38  ;;  %v3413_v0 = vmul.f32 %v4108_v52, %v3403_v53  ;;  %v3414_v2 = vmul.f32 %v4108_v52, %v3404_v54  ;;  %v3415_v1 = vmul.f32 %v4108_v52, %v3405_v55 }
 0x5c4   : > { %vm3416_vm2 = vcmp.ge.f32.partialorder %v3408_v56, 0.0  ;;  %vm3417_vm3 = vcmp.ge.f32.partialorder %v3409_v58, 0.0  ;;  %vm3418_vm4 = vcmp.ge.f32.partialorder %v3410_v59, 0.0  ;;  %vm3419_vm5 = vcmp.ge.f32.partialorder %v3411_v62, 0.0 }
 0x5c5   : > { %vm3420_vm6 = vcmp.ge.f32.partialorder %v3412_v63, 0.0  ;;  %vm3421_vm7 = vcmp.ge.f32.partialorder %v3413_v0, 0.0  ;;  %vm3422_vm8 = vcmp.ge.f32.partialorder %v3414_v2, 0.0  ;;  %vm3423_vm9 = vcmp.ge.f32.partialorder %v3415_v1, 0.0 }
 0x5c6   : > { %v3424_v57 = vmul.f32 0.2, %v3408_v56  ;;  %v3425_v60 = vmul.f32 0.2, %v3409_v58  ;;  %v3426_v61 = vmul.f32 0.2, %v3410_v59 }
 0x5c7   : > { %v3427_v3 = vmul.f32 0.2, %v3411_v62  ;;  %v3428_v4 = vmul.f32 0.2, %v3412_v63  ;;  %v3429_v5 = vmul.f32 0.2, %v3413_v0 }
 0x5c8   : > { %v3430_v6 = vmul.f32 0.2, %v3414_v2  ;;  %v3431_v7 = vmul.f32 0.2, %v3415_v1  ;;  %v3432_v8 = vsel %vm3416_vm2, %v3408_v56, %v3424_v57  ;;  %v3433_v9 = vsel %vm3417_vm3, %v3409_v58, %v3425_v60 }
 0x5c9   : > { %v3434_v10 = vsel %vm3418_vm4, %v3410_v59, %v3426_v61  ;;  %v3435_v11 = vsel %vm3419_vm5, %v3411_v62, %v3427_v3  ;;  %v3436_v12 = vsel %vm3420_vm6, %v3412_v63, %v3428_v4  ;;  %v3437_v13 = vsel %vm3421_vm7, %v3413_v0, %v3429_v5 }
 0x5ca   : > { %v3438_v14 = vsel %vm3422_vm8, %v3414_v2, %v3430_v6  ;;  %v3439_v15 = vsel %vm3423_vm9, %v3415_v1, %v3431_v7  ;;  %v3448_v16 = vcombine.low %v3432_v8, %v3433_v9  ;;  %v3449_v17 = vcombine.low %v3434_v10, %v3435_v11 }
 0x5cb   : > { %v3450_v18 = vcombine.low %v3436_v12, %v3437_v13  ;;  %v3451_v19 = vcombine.low %v3438_v14, %v3439_v15 }
 0x5cc   : > { %3456 = vst [vmem:[%s197_s16] sm:$0xff] %v3448_v16  ;;  %3457 = vst [vmem:[%s197_s16 + $0x8] sm:$0xff] %v3449_v17 }
 0x5cd   : > { %3458 = vst [vmem:[%s197_s16 + $0x10] sm:$0xff] %v3450_v18  ;;  %3459 = vst [vmem:[%s197_s16 + $0x18] sm:$0xff] %v3451_v19 }
 0x5ce PF: > { %s14_s15 = sadd.s32 1, %s4115_s15  }
 0x5cf   : > { %p11_p4 = scmp.ge.s32.totalorder %s14_s15, 4  }
 0x5d1   :  { %13 = sbr.rel (!%p11_p4) target bundleno = 1 (0x1), region = 70 }

</bundles_post_ra>
